<compile_context>
chip_gen: v6e
topology: v6e:2x2x1
jax: 0.10.0
libtpu: 0.0.40
codegen_flags: <defaults>
</compile_context>

<pallas_src>
import functools
import math

import jax
import jax.numpy as jnp
import numpy as np
from jax.experimental import pallas as pl
from jax.experimental.pallas import tpu as pltpu


# ---------------------------------------------------------------------------
# Fused Pallas kernel
# ---------------------------------------------------------------------------
def _token_mixer_kernel(x_ref, ctx_ref, wq_ref, wc_ref, bx_ref,
                        wcb_ref, bcb_ref, wqb_ref, bqb_ref, wproj_ref, bproj_ref,
                        ctx_out_ref, x_out_ref,
                        qh_acc, mean_acc, pad_buf,
                        *, H, S):
    """Fused CrossConv2d (with folded 1x1 V / V_context) + ReLU + context_branch conv
    + mean over S + query_branch conv + 1x1 proj.

    Per grid step (WC = W*C):
      x_ref      (H+2, WC)   bf16  query image, reflect-padded in H
      ctx_ref    (H+2, WC)   bf16  context image s, reflect-padded in H
      wq_ref     (3, WC, WC) bf16  query-half cross band weights (V folded in)
      wc_ref     (3, WC, WC) bf16  context-half cross band weights (V_context folded in)
      bx_ref     (1, WC)     f32   combined cross-conv bias
      wcb_ref    (3, WC, WC) bf16  context_branch band weights
      bcb_ref    (1, WC)     f32   context_branch bias
      wqb_ref    (3, WC, WC) bf16  query_branch band weights
      bqb_ref    (1, WC)     f32   query_branch bias
      wproj_ref  (WC, WC)    bf16  block-diagonal 1x1 proj weights
      bproj_ref  (1, WC)     f32   proj bias
      ctx_out_ref(H, WC)     f32   ReLU(context_branch(interaction))          [every s]
      x_out_ref  (H, WC)     f32   proj(ReLU(query_branch(mean_S interaction))) [s == S-1]
    """
    s = pl.program_id(1)

    @pl.when(s == 0)
    def _init():
        # Query-half contribution of the cross conv: constant over S, compute once per b.
        qh = jnp.zeros(qh_acc.shape, jnp.float32)
        for di in range(3):
            qh = qh + jnp.dot(x_ref[di:di + H, :], wq_ref[di],
                              preferred_element_type=jnp.float32)
        qh_acc[...] = qh + bx_ref[...]
        mean_acc[...] = jnp.zeros_like(mean_acc)

    # Context-half contribution for support element s + query half + bias, then ReLU.
    inter = qh_acc[...]
    for di in range(3):
        inter = inter + jnp.dot(ctx_ref[di:di + H, :], wc_ref[di],
                                preferred_element_type=jnp.float32)
    inter = jnp.maximum(inter, 0.0)                      # (H, WC) f32  == interaction

    # Running sum for the mean over S (query_new), kept in f32.
    mean_acc[...] = mean_acc[...] + inter

    # context_branch: 3x3 reflect conv + ReLU on the in-VMEM interaction.
    inter_lo = inter.astype(pad_buf.dtype)
    pad_buf[1:H + 1, :] = inter_lo
    pad_buf[0:1, :] = inter_lo[1:2, :]                     # reflect row -1 -> row 1
    pad_buf[H + 1:H + 2, :] = inter_lo[H - 2:H - 1, :]     # reflect row H  -> row H-2
    cb = bcb_ref[...]
    for di in range(3):
        cb = cb + jnp.dot(pad_buf[di:di + H, :], wcb_ref[di],
                          preferred_element_type=jnp.float32)
    ctx_out_ref[...] = jnp.maximum(cb, 0.0)

    @pl.when(s == S - 1)
    def _finalize():
        # query_new = mean over S; query_branch (3x3 reflect conv + ReLU) + 1x1 proj,
        # all on the VMEM-resident accumulator (no HBM round trip, no second kernel).
        q_mean = mean_acc[...] * (1.0 / S)
        q_lo = q_mean.astype(pad_buf.dtype)
        pad_buf[1:H + 1, :] = q_lo
        pad_buf[0:1, :] = q_lo[1:2, :]
        pad_buf[H + 1:H + 2, :] = q_lo[H - 2:H - 1, :]
        qb = bqb_ref[...]
        for di in range(3):
            qb = qb + jnp.dot(pad_buf[di:di + H, :], wqb_ref[di],
                              preferred_element_type=jnp.float32)
        q_out = jnp.maximum(qb, 0.0)
        x_out_ref[...] = (jnp.dot(q_out.astype(wproj_ref.dtype), wproj_ref[...],
                                  preferred_element_type=jnp.float32)
                          + bproj_ref[...])


# ---------------------------------------------------------------------------
# pallas_call wrapper
# ---------------------------------------------------------------------------
def _token_mixer_pass(x_rows, ctx_rows, packed, *, H, WC):
    B = x_rows.shape[0]
    S = ctx_rows.shape[1]
    cdt = packed["big_wq"].dtype
    kernel = functools.partial(_token_mixer_kernel, H=H, S=S)
    ctx_out, x_out = pl.pallas_call(
        kernel,
        out_shape=(jax.ShapeDtypeStruct((B, S, H, WC), jnp.float32),
                   jax.ShapeDtypeStruct((B, H, WC), jnp.float32)),
        grid_spec=pltpu.PrefetchScalarGridSpec(
            num_scalar_prefetch=0,
            grid=(B, S),
            in_specs=[
                pl.BlockSpec((None, H + 2, WC), lambda b, s: (b, 0, 0)),           # x
                pl.BlockSpec((None, None, H + 2, WC), lambda b, s: (b, s, 0, 0)),  # ctx
                pl.BlockSpec((3, WC, WC), lambda b, s: (0, 0, 0)),                 # Wq
                pl.BlockSpec((3, WC, WC), lambda b, s: (0, 0, 0)),                 # Wc
                pl.BlockSpec((1, WC), lambda b, s: (0, 0)),                        # b_cross
                pl.BlockSpec((3, WC, WC), lambda b, s: (0, 0, 0)),                 # Wcb
                pl.BlockSpec((1, WC), lambda b, s: (0, 0)),                        # b_cb
                pl.BlockSpec((3, WC, WC), lambda b, s: (0, 0, 0)),                 # Wqb
                pl.BlockSpec((1, WC), lambda b, s: (0, 0)),                        # b_qb
                pl.BlockSpec((WC, WC), lambda b, s: (0, 0)),                       # Wproj
                pl.BlockSpec((1, WC), lambda b, s: (0, 0)),                        # b_proj
            ],
            out_specs=[
                pl.BlockSpec((None, None, H, WC), lambda b, s: (b, s, 0, 0)),      # ctx_out
                pl.BlockSpec((None, H, WC), lambda b, s: (b, 0, 0)),               # x_out
            ],
            scratch_shapes=[
                pltpu.VMEM((H, WC), jnp.float32),   # query-half cross contribution (per b)
                pltpu.VMEM((H, WC), jnp.float32),   # mean-over-S accumulator
                pltpu.VMEM((H + 2, WC), cdt),       # H-padded staging buffer (reused)
            ],
        ),
        compiler_params=pltpu.CompilerParams(
            dimension_semantics=("parallel", "arbitrary"),
            vmem_limit_bytes=32 * 1024 * 1024,
        ),
    )(x_rows, ctx_rows, packed["big_wq"], packed["big_wc"], packed["b_cross"],
      packed["big_wcb"], packed["b_cb"], packed["big_wqb"], packed["b_qb"],
      packed["big_proj"], packed["b_proj"])
    return ctx_out, x_out


# ---------------------------------------------------------------------------
# Parameter init / packing (host-side, eager)
# ---------------------------------------------------------------------------
def _trunc_normal(key, shape, std):
    return std * jax.random.truncated_normal(key, -2.0, 2.0, shape, jnp.float32)


def init_params(key, dim, network_depth):
    """Deterministic init mirroring TokenMixer._init_weights (trunc-normal, zero bias)."""
    gain = (8 * network_depth) ** (-0.25)

    def std_for(cin, cout, k):
        fan_in, fan_out = cin * k * k, cout * k * k
        return gain * math.sqrt(2.0 / float(fan_in + fan_out))

    C = dim
    keys = jax.random.split(key, 6)
    cross_full = _trunc_normal(keys[2], (3, 3, 2 * C, C), std_for(2 * C, C, 3))
    return {
        # V / V_context: 1x1 convs (C -> C), weights as (Cin, Cout)
        "V_w": _trunc_normal(keys[0], (C, C), std_for(C, C, 1)),
        "V_b": jnp.zeros((C,), jnp.float32),
        "Vc_w": _trunc_normal(keys[1], (C, C), std_for(C, C, 1)),
        "Vc_b": jnp.zeros((C,), jnp.float32),
        # CrossConv2d 3x3 reflect conv (2C -> C), split into query/context halves,
        # stored as (3, 3, Cin, Cout)
        "Kq": cross_full[:, :, :C, :],
        "Kc": cross_full[:, :, C:, :],
        "cross_b": jnp.zeros((C,), jnp.float32),
        # query_branch / context_branch: 3x3 reflect conv + ReLU
        "Kqb": _trunc_normal(keys[3], (3, 3, C, C), std_for(C, C, 3)),
        "qb_b": jnp.zeros((C,), jnp.float32),
        "Kcb": _trunc_normal(keys[4], (3, 3, C, C), std_for(C, C, 3)),
        "cb_b": jnp.zeros((C,), jnp.float32),
        # proj: 1x1 conv (C -> C)
        "proj_w": _trunc_normal(keys[5], (C, C), std_for(C, C, 1)),
        "proj_b": jnp.zeros((C,), jnp.float32),
    }


def _band_conv_weight(k_taps, W):
    """k_taps: (3, 3, Cin, Cout) -> (3, W*Cin, W*Cout) band matrices that fold the
    W-direction 3-tap conv (with reflect padding) into a dense GEMM operand."""
    k = np.asarray(k_taps, dtype=np.float32)
    _, _, cin, cout = k.shape
    bw = np.zeros((3, W * cin, W * cout), np.float32)
    for w_out in range(W):
        for dj in range(3):
            w_in = w_out + dj - 1
            if w_in < 0:
                w_in = -w_in                      # reflect left
            elif w_in >= W:
                w_in = 2 * W - 2 - w_in           # reflect right
            bw[:, w_in * cin:(w_in + 1) * cin,
               w_out * cout:(w_out + 1) * cout] += k[:, dj]
    return jnp.asarray(bw)


def pack_params(params, H, W, compute_dtype=jnp.bfloat16):
    """Host-side (eager) packing: folds the 1x1 V / V_context convs into the two halves
    of the CrossConv2d kernel and builds the W-direction band-GEMM weights.  Not jittable
    (uses numpy); call once."""
    del H  # H handled by the halo at runtime
    C = params["V_w"].shape[0]
    WC = W * C
    kq, kc = params["Kq"], params["Kc"]
    kq_eff = jnp.einsum("im,abmo->abio", params["V_w"], kq)
    kc_eff = jnp.einsum("im,abmo->abio", params["Vc_w"], kc)
    b_cross = (params["cross_b"]
               + params["V_b"] @ jnp.sum(kq, axis=(0, 1))
               + params["Vc_b"] @ jnp.sum(kc, axis=(0, 1)))

    def tile_bias(b):
        return jnp.tile(b, W).reshape(1, WC).astype(jnp.float32)

    return {
        "big_wq": _band_conv_weight(kq_eff, W).astype(compute_dtype),
        "big_wc": _band_conv_weight(kc_eff, W).astype(compute_dtype),
        "b_cross": tile_bias(b_cross),
        "big_wcb": _band_conv_weight(params["Kcb"], W).astype(compute_dtype),
        "b_cb": tile_bias(params["cb_b"]),
        "big_wqb": _band_conv_weight(params["Kqb"], W).astype(compute_dtype),
        "b_qb": tile_bias(params["qb_b"]),
        "big_proj": jnp.kron(jnp.eye(W, dtype=jnp.float32),
                             params["proj_w"]).astype(compute_dtype),
        "b_proj": tile_bias(params["proj_b"]),
    }


# ---------------------------------------------------------------------------
# Forward pass (layout plumbing + one fused Pallas kernel)
# ---------------------------------------------------------------------------
def token_mixer_forward(packed, x, context):
    """x: (B, C, H, W) NCHW; context: (B, S, C, H, W).  Returns (x_out, context_out)."""
    B, C, H, W = x.shape
    S = context.shape[1]
    WC = W * C
    cdt = packed["big_wq"].dtype

    # NCHW -> NHWC, reflect-pad H by 1 (W reflect is folded into the band weights),
    # flatten (W, C) into the lane axis, cast matmul inputs to bf16.
    x_rows = jnp.transpose(x, (0, 2, 3, 1))
    x_rows = jnp.pad(x_rows, ((0, 0), (1, 1), (0, 0), (0, 0)), mode="reflect")
    x_rows = x_rows.reshape(B, H + 2, WC).astype(cdt)

    ctx_rows = jnp.transpose(context, (0, 1, 3, 4, 2))
    ctx_rows = jnp.pad(ctx_rows, ((0, 0), (0, 0), (1, 1), (0, 0), (0, 0)),
                       mode="reflect")
    ctx_rows = ctx_rows.reshape(B, S, H + 2, WC).astype(cdt)

    # One fused kernel: cross conv (+ folded V / V_context) + ReLU + context_branch
    # + mean-over-S + query_branch + proj.
    ctx_out_rows, x_out_rows = _token_mixer_pass(x_rows, ctx_rows, packed, H=H, WC=WC)

    x_out = jnp.transpose(x_out_rows.reshape(B, H, W, C), (0, 3, 1, 2))
    ctx_out = jnp.transpose(ctx_out_rows.reshape(B, S, H, W, C), (0, 1, 4, 2, 3))
    return x_out, ctx_out


# ---------------------------------------------------------------------------
# Pure-JAX reference (for correctness checking only)
# ---------------------------------------------------------------------------
def _reference_forward(params, x, context):
    B, C, H, W = x.shape
    S = context.shape[1]

    def conv3x3_reflect(inp, k, b):          # inp (N,H,W,Cin), k (3,3,Cin,Cout)
        xp = jnp.pad(inp, ((0, 0), (1, 1), (1, 1), (0, 0)), mode="reflect")
        out = jnp.zeros(inp.shape[:-1] + (k.shape[-1],), jnp.float32) + b
        for di in range(3):
            for dj in range(3):
                out = out + jnp.einsum("nhwc,co->nhwo",
                                       xp[:, di:di + H, dj:dj + W, :], k[di, dj])
        return out

    x_nhwc = jnp.transpose(x, (0, 2, 3, 1))
    ctx_nhwc = jnp.transpose(context, (0, 1, 3, 4, 2))
    V = x_nhwc @ params["V_w"] + params["V_b"]
    Vc = ctx_nhwc @ params["Vc_w"] + params["Vc_b"]

    q_half = conv3x3_reflect(V, params["Kq"], 0.0)
    inter = []
    for s in range(S):
        pre = q_half + conv3x3_reflect(Vc[:, s], params["Kc"], 0.0) + params["cross_b"]
        inter.append(jax.nn.relu(pre))
    inter = jnp.stack(inter, axis=1)                     # (B, S, H, W, C)

    q_new = inter.mean(axis=1)
    q_out = jax.nn.relu(conv3x3_reflect(q_new, params["Kqb"], params["qb_b"]))
    x_out = q_out @ params["proj_w"] + params["proj_b"]

    ctx_out = jax.nn.relu(conv3x3_reflect(inter.reshape(B * S, H, W, C),
                                          params["Kcb"], params["cb_b"]))
    return (jnp.transpose(x_out, (0, 3, 1, 2)),
            jnp.transpose(ctx_out.reshape(B, S, H, W, C), (0, 1, 4, 2, 3)))


if __name__ == "__main__":
    B, S, C, H, W = 2, 3, 8, 16, 16          # W*C = 128 -> lane-dense packing
    network_depth = 4

    key = jax.random.PRNGKey(0)
    kx, kctx, kp = jax.random.split(key, 3)
    x = jax.random.normal(kx, (B, C, H, W), jnp.float32)
    context = jax.random.normal(kctx, (B, S, C, H, W), jnp.float32)

    params = init_params(kp, C, network_depth)
    packed = pack_params(params, H, W)       # eager, host-side weight packing

    fwd = jax.jit(functools.partial(token_mixer_forward, packed))
    x_out, ctx_out = fwd(x, context)
    jax.block_until_ready((x_out, ctx_out))

    assert x_out.shape == (B, C, H, W)
    assert ctx_out.shape == (B, S, C, H, W)
    assert jnp.all(jnp.isfinite(x_out)) and jnp.all(jnp.isfinite(ctx_out))

    # Numerical check vs a pure-JAX reference (bf16 matmuls -> loose tolerance).
    x_ref, ctx_ref = _reference_forward(params, x, context)
    assert jnp.allclose(x_out, x_ref, rtol=3e-2, atol=3e-2)
    assert jnp.allclose(ctx_out, ctx_ref, rtol=3e-2, atol=3e-2)

    print("KERNEL_OK")
</pallas_src>

<mosaic_0001>
module attributes {stable_mosaic.version = 11 : i64} {
  func.func @_token_mixer_kernel(%arg0: i32, %arg1: i32, %arg2: memref<1x18x128xbf16, #tpu.memory_space<vmem>>, %arg3: memref<1x1x18x128xbf16, #tpu.memory_space<vmem>>, %arg4: memref<3x128x128xbf16, #tpu.memory_space<vmem>>, %arg5: memref<3x128x128xbf16, #tpu.memory_space<vmem>>, %arg6: memref<1x128xf32, #tpu.memory_space<vmem>>, %arg7: memref<3x128x128xbf16, #tpu.memory_space<vmem>>, %arg8: memref<1x128xf32, #tpu.memory_space<vmem>>, %arg9: memref<3x128x128xbf16, #tpu.memory_space<vmem>>, %arg10: memref<1x128xf32, #tpu.memory_space<vmem>>, %arg11: memref<128x128xbf16, #tpu.memory_space<vmem>>, %arg12: memref<1x128xf32, #tpu.memory_space<vmem>>, %arg13: memref<1x1x16x128xf32, #tpu.memory_space<vmem>>, %arg14: memref<1x16x128xf32, #tpu.memory_space<vmem>>, %arg15: memref<16x128xf32, #tpu.memory_space<vmem>>, %arg16: memref<16x128xf32, #tpu.memory_space<vmem>>, %arg17: memref<18x128xbf16, #tpu.memory_space<vmem>>) attributes {dimension_semantics = [#tpu.dimension_semantics<parallel>, #tpu.dimension_semantics<arbitrary>], iteration_bounds = array<i64: 2, 3>, scalar_prefetch = 0 : i64, scratch_operands = 3 : i64, tpu.core_type = #tpu.core_type<tc>, window_params = [{transform_indices = @transform_0, window_bounds = array<i64: 1, 18, 128>}, {transform_indices = @transform_1, window_bounds = array<i64: 1, 1, 18, 128>}, {pipeline_mode = #tpu.pipeline_mode<synchronous>, transform_indices = @transform_2, window_bounds = array<i64: 3, 128, 128>}, {pipeline_mode = #tpu.pipeline_mode<synchronous>, transform_indices = @transform_3, window_bounds = array<i64: 3, 128, 128>}, {pipeline_mode = #tpu.pipeline_mode<synchronous>, transform_indices = @transform_4, window_bounds = array<i64: 1, 128>}, {pipeline_mode = #tpu.pipeline_mode<synchronous>, transform_indices = @transform_5, window_bounds = array<i64: 3, 128, 128>}, {pipeline_mode = #tpu.pipeline_mode<synchronous>, transform_indices = @transform_6, window_bounds = array<i64: 1, 128>}, {pipeline_mode = #tpu.pipeline_mode<synchronous>, transform_indices = @transform_7, window_bounds = array<i64: 3, 128, 128>}, {pipeline_mode = #tpu.pipeline_mode<synchronous>, transform_indices = @transform_8, window_bounds = array<i64: 1, 128>}, {pipeline_mode = #tpu.pipeline_mode<synchronous>, transform_indices = @transform_9, window_bounds = array<i64: 128, 128>}, {pipeline_mode = #tpu.pipeline_mode<synchronous>, transform_indices = @transform_10, window_bounds = array<i64: 1, 128>}, {transform_indices = @transform_11, window_bounds = array<i64: 1, 1, 16, 128>}, {transform_indices = @transform_12, window_bounds = array<i64: 1, 16, 128>}]} {
    %c0_i32 = arith.constant 0 : i32
    %0 = arith.cmpi eq, %arg1, %c0_i32 : i32
    %1 = arith.extui %0 : i1 to i32
    %c0_i32_0 = arith.constant 0 : i32
    %2 = arith.cmpi ne, %1, %c0_i32_0 : i32
    scf.if %2 {
      %cst_59 = arith.constant 0.000000e+00 : f32
      %58 = vector.broadcast %cst_59 : f32 to vector<16x128xf32>
      %c0_60 = arith.constant 0 : index
      %c0_61 = arith.constant 0 : index
      %c0_62 = arith.constant 0 : index
      %59 = vector.load %arg2[%c0_60, %c0_61, %c0_62] : memref<1x18x128xbf16, #tpu.memory_space<vmem>>, vector<1x16x128xbf16>
      %60 = vector.shape_cast %59 : vector<1x16x128xbf16> to vector<16x128xbf16>
      %c0_63 = arith.constant 0 : index
      %c0_64 = arith.constant 0 : index
      %c0_65 = arith.constant 0 : index
      %61 = vector.load %arg4[%c0_63, %c0_64, %c0_65] : memref<3x128x128xbf16, #tpu.memory_space<vmem>>, vector<1x128x128xbf16>
      %62 = vector.shape_cast %61 : vector<1x128x128xbf16> to vector<128x128xbf16>
      %cst_66 = arith.constant dense<0.000000e+00> : vector<16x128xf32>
      %63 = tpu.matmul %60, %62, %cst_66 {dimension_numbers = #tpu.dot_dimension_numbers<[1], [0], [0], [1], [0, 0, 1, 1], [], []>} : vector<16x128xbf16>, vector<128x128xbf16>, vector<16x128xf32> -> vector<16x128xf32>
      %64 = arith.addf %58, %63 : vector<16x128xf32>
      %c0_67 = arith.constant 0 : index
      %c1_68 = arith.constant 1 : index
      %c0_69 = arith.constant 0 : index
      %65 = vector.load %arg2[%c0_67, %c1_68, %c0_69] : memref<1x18x128xbf16, #tpu.memory_space<vmem>>, vector<1x16x128xbf16>
      %66 = vector.shape_cast %65 : vector<1x16x128xbf16> to vector<16x128xbf16>
      %c1_70 = arith.constant 1 : index
      %c0_71 = arith.constant 0 : index
      %c0_72 = arith.constant 0 : index
      %67 = vector.load %arg4[%c1_70, %c0_71, %c0_72] : memref<3x128x128xbf16, #tpu.memory_space<vmem>>, vector<1x128x128xbf16>
      %68 = vector.shape_cast %67 : vector<1x128x128xbf16> to vector<128x128xbf16>
      %cst_73 = arith.constant dense<0.000000e+00> : vector<16x128xf32>
      %69 = tpu.matmul %66, %68, %cst_73 {dimension_numbers = #tpu.dot_dimension_numbers<[1], [0], [0], [1], [0, 0, 1, 1], [], []>} : vector<16x128xbf16>, vector<128x128xbf16>, vector<16x128xf32> -> vector<16x128xf32>
      %70 = arith.addf %64, %69 : vector<16x128xf32>
      %c0_74 = arith.constant 0 : index
      %c2_75 = arith.constant 2 : index
      %c0_76 = arith.constant 0 : index
      %71 = vector.load %arg2[%c0_74, %c2_75, %c0_76] : memref<1x18x128xbf16, #tpu.memory_space<vmem>>, vector<1x16x128xbf16>
      %72 = vector.shape_cast %71 : vector<1x16x128xbf16> to vector<16x128xbf16>
      %c2_77 = arith.constant 2 : index
      %c0_78 = arith.constant 0 : index
      %c0_79 = arith.constant 0 : index
      %73 = vector.load %arg4[%c2_77, %c0_78, %c0_79] : memref<3x128x128xbf16, #tpu.memory_space<vmem>>, vector<1x128x128xbf16>
      %74 = vector.shape_cast %73 : vector<1x128x128xbf16> to vector<128x128xbf16>
      %cst_80 = arith.constant dense<0.000000e+00> : vector<16x128xf32>
      %75 = tpu.matmul %72, %74, %cst_80 {dimension_numbers = #tpu.dot_dimension_numbers<[1], [0], [0], [1], [0, 0, 1, 1], [], []>} : vector<16x128xbf16>, vector<128x128xbf16>, vector<16x128xf32> -> vector<16x128xf32>
      %76 = arith.addf %70, %75 : vector<16x128xf32>
      %c0_81 = arith.constant 0 : index
      %c0_82 = arith.constant 0 : index
      %77 = vector.load %arg6[%c0_81, %c0_82] : memref<1x128xf32, #tpu.memory_space<vmem>>, vector<1x128xf32>
      %78 = vector.broadcast %77 : vector<1x128xf32> to vector<16x128xf32>
      %79 = arith.addf %76, %78 : vector<16x128xf32>
      %c0_83 = arith.constant 0 : index
      %c0_84 = arith.constant 0 : index
      %80 = vector.load %arg15[%c0_83, %c0_84] : memref<16x128xf32, #tpu.memory_space<vmem>>, vector<16x128xf32>
      tpu.vector_store %arg15[%c0_83, %c0_84], %79 {strides = array<i32>} : memref<16x128xf32, #tpu.memory_space<vmem>>, vector<16x128xf32>,
      %cst_85 = arith.constant 0.000000e+00 : f32
      %81 = vector.broadcast %cst_85 : f32 to vector<16x128xf32>
      %c0_86 = arith.constant 0 : index
      %c0_87 = arith.constant 0 : index
      %82 = vector.load %arg16[%c0_86, %c0_87] : memref<16x128xf32, #tpu.memory_space<vmem>>, vector<16x128xf32>
      tpu.vector_store %arg16[%c0_86, %c0_87], %81 {strides = array<i32>} : memref<16x128xf32, #tpu.memory_space<vmem>>, vector<16x128xf32>,
    } else {
    }
    %c0 = arith.constant 0 : index
    %c0_1 = arith.constant 0 : index
    %3 = vector.load %arg15[%c0, %c0_1] : memref<16x128xf32, #tpu.memory_space<vmem>>, vector<16x128xf32>
    %c0_2 = arith.constant 0 : index
    %c0_3 = arith.constant 0 : index
    %c0_4 = arith.constant 0 : index
    %c0_5 = arith.constant 0 : index
    %4 = vector.load %arg3[%c0_2, %c0_3, %c0_4, %c0_5] : memref<1x1x18x128xbf16, #tpu.memory_space<vmem>>, vector<1x1x16x128xbf16>
    %5 = vector.shape_cast %4 : vector<1x1x16x128xbf16> to vector<16x128xbf16>
    %c0_6 = arith.constant 0 : index
    %c0_7 = arith.constant 0 : index
    %c0_8 = arith.constant 0 : index
    %6 = vector.load %arg5[%c0_6, %c0_7, %c0_8] : memref<3x128x128xbf16, #tpu.memory_space<vmem>>, vector<1x128x128xbf16>
    %7 = vector.shape_cast %6 : vector<1x128x128xbf16> to vector<128x128xbf16>
    %cst = arith.constant dense<0.000000e+00> : vector<16x128xf32>
    %8 = tpu.matmul %5, %7, %cst {dimension_numbers = #tpu.dot_dimension_numbers<[1], [0], [0], [1], [0, 0, 1, 1], [], []>} : vector<16x128xbf16>, vector<128x128xbf16>, vector<16x128xf32> -> vector<16x128xf32>
    %9 = arith.addf %3, %8 : vector<16x128xf32>
    %c0_9 = arith.constant 0 : index
    %c0_10 = arith.constant 0 : index
    %c1 = arith.constant 1 : index
    %c0_11 = arith.constant 0 : index
    %10 = vector.load %arg3[%c0_9, %c0_10, %c1, %c0_11] : memref<1x1x18x128xbf16, #tpu.memory_space<vmem>>, vector<1x1x16x128xbf16>
    %11 = vector.shape_cast %10 : vector<1x1x16x128xbf16> to vector<16x128xbf16>
    %c1_12 = arith.constant 1 : index
    %c0_13 = arith.constant 0 : index
    %c0_14 = arith.constant 0 : index
    %12 = vector.load %arg5[%c1_12, %c0_13, %c0_14] : memref<3x128x128xbf16, #tpu.memory_space<vmem>>, vector<1x128x128xbf16>
    %13 = vector.shape_cast %12 : vector<1x128x128xbf16> to vector<128x128xbf16>
    %cst_15 = arith.constant dense<0.000000e+00> : vector<16x128xf32>
    %14 = tpu.matmul %11, %13, %cst_15 {dimension_numbers = #tpu.dot_dimension_numbers<[1], [0], [0], [1], [0, 0, 1, 1], [], []>} : vector<16x128xbf16>, vector<128x128xbf16>, vector<16x128xf32> -> vector<16x128xf32>
    %15 = arith.addf %9, %14 : vector<16x128xf32>
    %c0_16 = arith.constant 0 : index
    %c0_17 = arith.constant 0 : index
    %c2 = arith.constant 2 : index
    %c0_18 = arith.constant 0 : index
    %16 = vector.load %arg3[%c0_16, %c0_17, %c2, %c0_18] : memref<1x1x18x128xbf16, #tpu.memory_space<vmem>>, vector<1x1x16x128xbf16>
    %17 = vector.shape_cast %16 : vector<1x1x16x128xbf16> to vector<16x128xbf16>
    %c2_19 = arith.constant 2 : index
    %c0_20 = arith.constant 0 : index
    %c0_21 = arith.constant 0 : index
    %18 = vector.load %arg5[%c2_19, %c0_20, %c0_21] : memref<3x128x128xbf16, #tpu.memory_space<vmem>>, vector<1x128x128xbf16>
    %19 = vector.shape_cast %18 : vector<1x128x128xbf16> to vector<128x128xbf16>
    %cst_22 = arith.constant dense<0.000000e+00> : vector<16x128xf32>
    %20 = tpu.matmul %17, %19, %cst_22 {dimension_numbers = #tpu.dot_dimension_numbers<[1], [0], [0], [1], [0, 0, 1, 1], [], []>} : vector<16x128xbf16>, vector<128x128xbf16>, vector<16x128xf32> -> vector<16x128xf32>
    %21 = arith.addf %15, %20 : vector<16x128xf32>
    %cst_23 = arith.constant 0.000000e+00 : f32
    %22 = vector.broadcast %cst_23 : f32 to vector<16x128xf32>
    %23 = arith.maximumf %21, %22 : vector<16x128xf32>
    %c0_24 = arith.constant 0 : index
    %c0_25 = arith.constant 0 : index
    %24 = vector.load %arg16[%c0_24, %c0_25] : memref<16x128xf32, #tpu.memory_space<vmem>>, vector<16x128xf32>
    %25 = arith.addf %24, %23 : vector<16x128xf32>
    %c0_26 = arith.constant 0 : index
    %c0_27 = arith.constant 0 : index
    %26 = vector.load %arg16[%c0_26, %c0_27] : memref<16x128xf32, #tpu.memory_space<vmem>>, vector<16x128xf32>
    tpu.vector_store %arg16[%c0_26, %c0_27], %25 {strides = array<i32>} : memref<16x128xf32, #tpu.memory_space<vmem>>, vector<16x128xf32>,
    %27 = arith.truncf %23 : vector<16x128xf32> to vector<16x128xbf16>
    %c1_28 = arith.constant 1 : index
    %c0_29 = arith.constant 0 : index
    %28 = vector.load %arg17[%c1_28, %c0_29] : memref<18x128xbf16, #tpu.memory_space<vmem>>, vector<16x128xbf16>
    tpu.vector_store %arg17[%c1_28, %c0_29], %27 {strides = array<i32>} : memref<18x128xbf16, #tpu.memory_space<vmem>>, vector<16x128xbf16>,
    %29 = vector.extract_strided_slice %27 {offsets = [1, 0], sizes = [1, 128], strides = [1, 1]} : vector<16x128xbf16> to vector<1x128xbf16>
    %c0_30 = arith.constant 0 : index
    %c0_31 = arith.constant 0 : index
    %30 = vector.load %arg17[%c0_30, %c0_31] : memref<18x128xbf16, #tpu.memory_space<vmem>>, vector<1x128xbf16>
    tpu.vector_store %arg17[%c0_30, %c0_31], %29 {strides = array<i32>} : memref<18x128xbf16, #tpu.memory_space<vmem>>, vector<1x128xbf16>,
    %31 = vector.extract_strided_slice %27 {offsets = [14, 0], sizes = [1, 128], strides = [1, 1]} : vector<16x128xbf16> to vector<1x128xbf16>
    %c17 = arith.constant 17 : index
    %c0_32 = arith.constant 0 : index
    %32 = vector.load %arg17[%c17, %c0_32] : memref<18x128xbf16, #tpu.memory_space<vmem>>, vector<1x128xbf16>
    tpu.vector_store %arg17[%c17, %c0_32], %31 {strides = array<i32>} : memref<18x128xbf16, #tpu.memory_space<vmem>>, vector<1x128xbf16>,
    %c0_33 = arith.constant 0 : index
    %c0_34 = arith.constant 0 : index
    %33 = vector.load %arg8[%c0_33, %c0_34] : memref<1x128xf32, #tpu.memory_space<vmem>>, vector<1x128xf32>
    %c0_35 = arith.constant 0 : index
    %c0_36 = arith.constant 0 : index
    %34 = vector.load %arg17[%c0_35, %c0_36] : memref<18x128xbf16, #tpu.memory_space<vmem>>, vector<16x128xbf16>
    %c0_37 = arith.constant 0 : index
    %c0_38 = arith.constant 0 : index
    %c0_39 = arith.constant 0 : index
    %35 = vector.load %arg7[%c0_37, %c0_38, %c0_39] : memref<3x128x128xbf16, #tpu.memory_space<vmem>>, vector<1x128x128xbf16>
    %36 = vector.shape_cast %35 : vector<1x128x128xbf16> to vector<128x128xbf16>
    %cst_40 = arith.constant dense<0.000000e+00> : vector<16x128xf32>
    %37 = tpu.matmul %34, %36, %cst_40 {dimension_numbers = #tpu.dot_dimension_numbers<[1], [0], [0], [1], [0, 0, 1, 1], [], []>} : vector<16x128xbf16>, vector<128x128xbf16>, vector<16x128xf32> -> vector<16x128xf32>
    %38 = vector.broadcast %33 : vector<1x128xf32> to vector<16x128xf32>
    %39 = arith.addf %38, %37 : vector<16x128xf32>
    %c1_41 = arith.constant 1 : index
    %c0_42 = arith.constant 0 : index
    %40 = vector.load %arg17[%c1_41, %c0_42] : memref<18x128xbf16, #tpu.memory_space<vmem>>, vector<16x128xbf16>
    %c1_43 = arith.constant 1 : index
    %c0_44 = arith.constant 0 : index
    %c0_45 = arith.constant 0 : index
    %41 = vector.load %arg7[%c1_43, %c0_44, %c0_45] : memref<3x128x128xbf16, #tpu.memory_space<vmem>>, vector<1x128x128xbf16>
    %42 = vector.shape_cast %41 : vector<1x128x128xbf16> to vector<128x128xbf16>
    %cst_46 = arith.constant dense<0.000000e+00> : vector<16x128xf32>
    %43 = tpu.matmul %40, %42, %cst_46 {dimension_numbers = #tpu.dot_dimension_numbers<[1], [0], [0], [1], [0, 0, 1, 1], [], []>} : vector<16x128xbf16>, vector<128x128xbf16>, vector<16x128xf32> -> vector<16x128xf32>
    %44 = arith.addf %39, %43 : vector<16x128xf32>
    %c2_47 = arith.constant 2 : index
    %c0_48 = arith.constant 0 : index
    %45 = vector.load %arg17[%c2_47, %c0_48] : memref<18x128xbf16, #tpu.memory_space<vmem>>, vector<16x128xbf16>
    %c2_49 = arith.constant 2 : index
    %c0_50 = arith.constant 0 : index
    %c0_51 = arith.constant 0 : index
    %46 = vector.load %arg7[%c2_49, %c0_50, %c0_51] : memref<3x128x128xbf16, #tpu.memory_space<vmem>>, vector<1x128x128xbf16>
    %47 = vector.shape_cast %46 : vector<1x128x128xbf16> to vector<128x128xbf16>
    %cst_52 = arith.constant dense<0.000000e+00> : vector<16x128xf32>
    %48 = tpu.matmul %45, %47, %cst_52 {dimension_numbers = #tpu.dot_dimension_numbers<[1], [0], [0], [1], [0, 0, 1, 1], [], []>} : vector<16x128xbf16>, vector<128x128xbf16>, vector<16x128xf32> -> vector<16x128xf32>
    %49 = arith.addf %44, %48 : vector<16x128xf32>
    %cst_53 = arith.constant 0.000000e+00 : f32
    %50 = vector.broadcast %cst_53 : f32 to vector<16x128xf32>
    %51 = arith.maximumf %49, %50 : vector<16x128xf32>
    %c0_54 = arith.constant 0 : index
    %c0_55 = arith.constant 0 : index
    %c0_56 = arith.constant 0 : index
    %c0_57 = arith.constant 0 : index
    %52 = vector.load %arg13[%c0_54, %c0_55, %c0_56, %c0_57] : memref<1x1x16x128xf32, #tpu.memory_space<vmem>>, vector<1x1x16x128xf32>
    %53 = vector.shape_cast %52 : vector<1x1x16x128xf32> to vector<16x128xf32>
    %54 = vector.shape_cast %51 : vector<16x128xf32> to vector<1x1x16x128xf32>
    tpu.vector_store %arg13[%c0_54, %c0_55, %c0_56, %c0_57], %54 {strides = array<i32>} : memref<1x1x16x128xf32, #tpu.memory_space<vmem>>, vector<1x1x16x128xf32>,
    %c2_i32 = arith.constant 2 : i32
    %55 = arith.cmpi eq, %arg1, %c2_i32 : i32
    %56 = arith.extui %55 : i1 to i32
    %c0_i32_58 = arith.constant 0 : i32
    %57 = arith.cmpi ne, %56, %c0_i32_58 : i32
    scf.if %57 {
      %c0_59 = arith.constant 0 : index
      %c0_60 = arith.constant 0 : index
      %58 = vector.load %arg16[%c0_59, %c0_60] : memref<16x128xf32, #tpu.memory_space<vmem>>, vector<16x128xf32>
      %cst_61 = arith.constant 0.333333343 : f32
      %59 = vector.broadcast %cst_61 : f32 to vector<16x128xf32>
      %60 = arith.mulf %58, %59 : vector<16x128xf32>
      %61 = arith.truncf %60 : vector<16x128xf32> to vector<16x128xbf16>
      %c1_62 = arith.constant 1 : index
      %c0_63 = arith.constant 0 : index
      %62 = vector.load %arg17[%c1_62, %c0_63] : memref<18x128xbf16, #tpu.memory_space<vmem>>, vector<16x128xbf16>
      tpu.vector_store %arg17[%c1_62, %c0_63], %61 {strides = array<i32>} : memref<18x128xbf16, #tpu.memory_space<vmem>>, vector<16x128xbf16>,
      %63 = vector.extract_strided_slice %61 {offsets = [1, 0], sizes = [1, 128], strides = [1, 1]} : vector<16x128xbf16> to vector<1x128xbf16>
      %c0_64 = arith.constant 0 : index
      %c0_65 = arith.constant 0 : index
      %64 = vector.load %arg17[%c0_64, %c0_65] : memref<18x128xbf16, #tpu.memory_space<vmem>>, vector<1x128xbf16>
      tpu.vector_store %arg17[%c0_64, %c0_65], %63 {strides = array<i32>} : memref<18x128xbf16, #tpu.memory_space<vmem>>, vector<1x128xbf16>,
      %65 = vector.extract_strided_slice %61 {offsets = [14, 0], sizes = [1, 128], strides = [1, 1]} : vector<16x128xbf16> to vector<1x128xbf16>
      %c17_66 = arith.constant 17 : index
      %c0_67 = arith.constant 0 : index
      %66 = vector.load %arg17[%c17_66, %c0_67] : memref<18x128xbf16, #tpu.memory_space<vmem>>, vector<1x128xbf16>
      tpu.vector_store %arg17[%c17_66, %c0_67], %65 {strides = array<i32>} : memref<18x128xbf16, #tpu.memory_space<vmem>>, vector<1x128xbf16>,
      %c0_68 = arith.constant 0 : index
      %c0_69 = arith.constant 0 : index
      %67 = vector.load %arg10[%c0_68, %c0_69] : memref<1x128xf32, #tpu.memory_space<vmem>>, vector<1x128xf32>
      %c0_70 = arith.constant 0 : index
      %c0_71 = arith.constant 0 : index
      %68 = vector.load %arg17[%c0_70, %c0_71] : memref<18x128xbf16, #tpu.memory_space<vmem>>, vector<16x128xbf16>
      %c0_72 = arith.constant 0 : index
      %c0_73 = arith.constant 0 : index
      %c0_74 = arith.constant 0 : index
      %69 = vector.load %arg9[%c0_72, %c0_73, %c0_74] : memref<3x128x128xbf16, #tpu.memory_space<vmem>>, vector<1x128x128xbf16>
      %70 = vector.shape_cast %69 : vector<1x128x128xbf16> to vector<128x128xbf16>
      %cst_75 = arith.constant dense<0.000000e+00> : vector<16x128xf32>
      %71 = tpu.matmul %68, %70, %cst_75 {dimension_numbers = #tpu.dot_dimension_numbers<[1], [0], [0], [1], [0, 0, 1, 1], [], []>} : vector<16x128xbf16>, vector<128x128xbf16>, vector<16x128xf32> -> vector<16x128xf32>
      %72 = vector.broadcast %67 : vector<1x128xf32> to vector<16x128xf32>
      %73 = arith.addf %72, %71 : vector<16x128xf32>
      %c1_76 = arith.constant 1 : index
      %c0_77 = arith.constant 0 : index
      %74 = vector.load %arg17[%c1_76, %c0_77] : memref<18x128xbf16, #tpu.memory_space<vmem>>, vector<16x128xbf16>
      %c1_78 = arith.constant 1 : index
      %c0_79 = arith.constant 0 : index
      %c0_80 = arith.constant 0 : index
      %75 = vector.load %arg9[%c1_78, %c0_79, %c0_80] : memref<3x128x128xbf16, #tpu.memory_space<vmem>>, vector<1x128x128xbf16>
      %76 = vector.shape_cast %75 : vector<1x128x128xbf16> to vector<128x128xbf16>
      %cst_81 = arith.constant dense<0.000000e+00> : vector<16x128xf32>
      %77 = tpu.matmul %74, %76, %cst_81 {dimension_numbers = #tpu.dot_dimension_numbers<[1], [0], [0], [1], [0, 0, 1, 1], [], []>} : vector<16x128xbf16>, vector<128x128xbf16>, vector<16x128xf32> -> vector<16x128xf32>
      %78 = arith.addf %73, %77 : vector<16x128xf32>
      %c2_82 = arith.constant 2 : index
      %c0_83 = arith.constant 0 : index
      %79 = vector.load %arg17[%c2_82, %c0_83] : memref<18x128xbf16, #tpu.memory_space<vmem>>, vector<16x128xbf16>
      %c2_84 = arith.constant 2 : index
      %c0_85 = arith.constant 0 : index
      %c0_86 = arith.constant 0 : index
      %80 = vector.load %arg9[%c2_84, %c0_85, %c0_86] : memref<3x128x128xbf16, #tpu.memory_space<vmem>>, vector<1x128x128xbf16>
      %81 = vector.shape_cast %80 : vector<1x128x128xbf16> to vector<128x128xbf16>
      %cst_87 = arith.constant dense<0.000000e+00> : vector<16x128xf32>
      %82 = tpu.matmul %79, %81, %cst_87 {dimension_numbers = #tpu.dot_dimension_numbers<[1], [0], [0], [1], [0, 0, 1, 1], [], []>} : vector<16x128xbf16>, vector<128x128xbf16>, vector<16x128xf32> -> vector<16x128xf32>
      %83 = arith.addf %78, %82 : vector<16x128xf32>
      %cst_88 = arith.constant 0.000000e+00 : f32
      %84 = vector.broadcast %cst_88 : f32 to vector<16x128xf32>
      %85 = arith.maximumf %83, %84 : vector<16x128xf32>
      %86 = arith.truncf %85 : vector<16x128xf32> to vector<16x128xbf16>
      %c0_89 = arith.constant 0 : index
      %c0_90 = arith.constant 0 : index
      %87 = vector.load %arg11[%c0_89, %c0_90] : memref<128x128xbf16, #tpu.memory_space<vmem>>, vector<128x128xbf16>
      %cst_91 = arith.constant dense<0.000000e+00> : vector<16x128xf32>
      %88 = tpu.matmul %86, %87, %cst_91 {dimension_numbers = #tpu.dot_dimension_numbers<[1], [0], [0], [1], [0, 0, 1, 1], [], []>} : vector<16x128xbf16>, vector<128x128xbf16>, vector<16x128xf32> -> vector<16x128xf32>
      %c0_92 = arith.constant 0 : index
      %c0_93 = arith.constant 0 : index
      %89 = vector.load %arg12[%c0_92, %c0_93] : memref<1x128xf32, #tpu.memory_space<vmem>>, vector<1x128xf32>
      %90 = vector.broadcast %89 : vector<1x128xf32> to vector<16x128xf32>
      %91 = arith.addf %88, %90 : vector<16x128xf32>
      %c0_94 = arith.constant 0 : index
      %c0_95 = arith.constant 0 : index
      %c0_96 = arith.constant 0 : index
      %92 = vector.load %arg14[%c0_94, %c0_95, %c0_96] : memref<1x16x128xf32, #tpu.memory_space<vmem>>, vector<1x16x128xf32>
      %93 = vector.shape_cast %92 : vector<1x16x128xf32> to vector<16x128xf32>
      %94 = vector.shape_cast %91 : vector<16x128xf32> to vector<1x16x128xf32>
      tpu.vector_store %arg14[%c0_94, %c0_95, %c0_96], %94 {strides = array<i32>} : memref<1x16x128xf32, #tpu.memory_space<vmem>>, vector<1x16x128xf32>,
    } else {
    }
    return
  }
  func.func @transform_0(%arg0: i32, %arg1: i32) -> (i32, i32, i32) {
    %c0_i32 = arith.constant 0 : i32
    %c0_i32_0 = arith.constant 0 : i32
    %c0_i32_1 = arith.constant 0 : i32
    return %arg0, %c0_i32, %c0_i32_0 : i32, i32, i32
  }
  func.func @transform_1(%arg0: i32, %arg1: i32) -> (i32, i32, i32, i32) {
    %c0_i32 = arith.constant 0 : i32
    %c0_i32_0 = arith.constant 0 : i32
    %c0_i32_1 = arith.constant 0 : i32
    return %arg0, %arg1, %c0_i32, %c0_i32_0 : i32, i32, i32, i32
  }
  func.func @transform_2(%arg0: i32, %arg1: i32) -> (i32, i32, i32) {
    %c0_i32 = arith.constant 0 : i32
    %c0_i32_0 = arith.constant 0 : i32
    %c0_i32_1 = arith.constant 0 : i32
    %c0_i32_2 = arith.constant 0 : i32
    return %c0_i32, %c0_i32_0, %c0_i32_1 : i32, i32, i32
  }
  func.func @transform_3(%arg0: i32, %arg1: i32) -> (i32, i32, i32) {
    %c0_i32 = arith.constant 0 : i32
    %c0_i32_0 = arith.constant 0 : i32
    %c0_i32_1 = arith.constant 0 : i32
    %c0_i32_2 = arith.constant 0 : i32
    return %c0_i32, %c0_i32_0, %c0_i32_1 : i32, i32, i32
  }
  func.func @transform_4(%arg0: i32, %arg1: i32) -> (i32, i32) {
    %c0_i32 = arith.constant 0 : i32
    %c0_i32_0 = arith.constant 0 : i32
    %c0_i32_1 = arith.constant 0 : i32
    return %c0_i32, %c0_i32_0 : i32, i32
  }
  func.func @transform_5(%arg0: i32, %arg1: i32) -> (i32, i32, i32) {
    %c0_i32 = arith.constant 0 : i32
    %c0_i32_0 = arith.constant 0 : i32
    %c0_i32_1 = arith.constant 0 : i32
    %c0_i32_2 = arith.constant 0 : i32
    return %c0_i32, %c0_i32_0, %c0_i32_1 : i32, i32, i32
  }
  func.func @transform_6(%arg0: i32, %arg1: i32) -> (i32, i32) {
    %c0_i32 = arith.constant 0 : i32
    %c0_i32_0 = arith.constant 0 : i32
    %c0_i32_1 = arith.constant 0 : i32
    return %c0_i32, %c0_i32_0 : i32, i32
  }
  func.func @transform_7(%arg0: i32, %arg1: i32) -> (i32, i32, i32) {
    %c0_i32 = arith.constant 0 : i32
    %c0_i32_0 = arith.constant 0 : i32
    %c0_i32_1 = arith.constant 0 : i32
    %c0_i32_2 = arith.constant 0 : i32
    return %c0_i32, %c0_i32_0, %c0_i32_1 : i32, i32, i32
  }
  func.func @transform_8(%arg0: i32, %arg1: i32) -> (i32, i32) {
    %c0_i32 = arith.constant 0 : i32
    %c0_i32_0 = arith.constant 0 : i32
    %c0_i32_1 = arith.constant 0 : i32
    return %c0_i32, %c0_i32_0 : i32, i32
  }
  func.func @transform_9(%arg0: i32, %arg1: i32) -> (i32, i32) {
    %c0_i32 = arith.constant 0 : i32
    %c0_i32_0 = arith.constant 0 : i32
    %c0_i32_1 = arith.constant 0 : i32
    return %c0_i32, %c0_i32_0 : i32, i32
  }
  func.func @transform_10(%arg0: i32, %arg1: i32) -> (i32, i32) {
    %c0_i32 = arith.constant 0 : i32
    %c0_i32_0 = arith.constant 0 : i32
    %c0_i32_1 = arith.constant 0 : i32
    return %c0_i32, %c0_i32_0 : i32, i32
  }
  func.func @transform_11(%arg0: i32, %arg1: i32) -> (i32, i32, i32, i32) {
    %c0_i32 = arith.constant 0 : i32
    %c0_i32_0 = arith.constant 0 : i32
    %c0_i32_1 = arith.constant 0 : i32
    return %arg0, %arg1, %c0_i32, %c0_i32_0 : i32, i32, i32, i32
  }
  func.func @transform_12(%arg0: i32, %arg1: i32) -> (i32, i32, i32) {
    %c0_i32 = arith.constant 0 : i32
    %c0_i32_0 = arith.constant 0 : i32
    %c0_i32_1 = arith.constant 0 : i32
    return %arg0, %c0_i32, %c0_i32_0 : i32, i32, i32
  }
}

</mosaic_0001>

<bundles_post_ra>
// kernel: token_mixer_forward.1
= control target key start
LH: loop header
LB: loop body
LE: loop exit
PB: predicated region body
PF: predicated region fallthrough
CT: control target
= control target key end

     0   :  { %s3274_s21 = smov 0   ;;  %s3276_s22 = smov 0   ;;  %s3860_s0 = inlined_call_operand.vmem [shape: bf16[2,18,128], index: 0, kind: input, shape index: {}]   ;;  %s3861_s1 = inlined_call_operand.vmem [shape: bf16[2,3,18,128], index: 1, kind: input, shape index: {}]   ;;  %s3862_s2 = inlined_call_operand.vmem [shape: bf16[3,128,128], index: 2, kind: input, shape index: {}]   ;;  %s3863_s3 = inlined_call_operand.vmem [shape: bf16[3,128,128], index: 3, kind: input, shape index: {}]   ;;  %s3864_s4 = inlined_call_operand.vmem [shape: f32[1,128], index: 4, kind: input, shape index: {}, may-alias: {4,6,8,10}]   ;;  %s3865_s5 = inlined_call_operand.vmem [shape: bf16[3,128,128], index: 5, kind: input, shape index: {}]   ;;  %s3866_s6 = inlined_call_operand.vmem [shape: f32[1,128], index: 6, kind: input, shape index: {}, may-alias: {4,6,8,10}]   ;;  %s3867_s7 = inlined_call_operand.vmem [shape: bf16[3,128,128], index: 7, kind: input, shape index: {}]   ;;  %s3868_s8 = inlined_call_operand.vmem [shape: f32[1,128], index: 8, kind: input, shape index: {}, may-alias: {4,6,8,10}]   ;;  %s3869_s9 = inlined_call_operand.vmem [shape: bf16[128,128], index: 9, kind: input, shape index: {}]   ;;  %s3870_s10 = inlined_call_operand.vmem [shape: f32[1,128], index: 10, kind: input, shape index: {}, may-alias: {4,6,8,10}]   ;;  %s3871_s11 = inlined_call_operand.vmem [shape: f32[2,3,16,128], index: 11, kind: output, shape index: {0}]   ;;  %s3872_s12 = inlined_call_operand.vmem [shape: f32[2,16,128], index: 12, kind: output, shape index: {1}]  }
   0x1   :  { %3878 = sst [smem:[#allocation10_spill]] %s3867_s7  ;;  %s3278_s23 = smov 0  }
   0x2   :  { %3879 = sst [smem:[#allocation11_spill]] %s3868_s8  ;;  %s3280_s24 = smov 0  }
   0x3   :  { %3880 = sst [smem:[#allocation12_spill]] %s3869_s9  ;;  %s3282_s25 = smov 0  }
   0x4   :  { %3881 = sst [smem:[#allocation13_spill]] %s3870_s10 }
   0x5 LB: > { %3882 = sst [smem:[#allocation5_spill]] %s3193_s23  ;;  %s32_s26 = sadd.s32 1, %s3193_s23  ;;  %s3201_s25 = sphi %s3282_s25, %s23_s25   ;;  %s3197_s24 = sphi %s3280_s24, %s3904_s24   ;;  %s3193_s23 = sphi %s3278_s23, %s3903_s23   ;;  %s3189_s22 = sphi %s3276_s22, %s3902_s22   ;;  %s3185_s21 = sphi %s3274_s21, %s3901_s21  }
   0x6   : > { %3883 = sst [smem:[#allocation6_spill]] %s3197_s24  ;;  %s35_s27 = sadd.s32 1, %s3197_s24 }
   0x7   : > { %3884 = sst [smem:[#allocation7_spill]] %s3201_s25  ;;  %p33_p0 = scmp.ge.s32.totalorder %s32_s26, 3 }
   0x8   : > { %p2342_p1 = scmp.ge.s32.totalorder %s3201_s25, 1  ;;  %p395_p2 = scmp.lt.s32.totalorder %s3201_s25, 7 }
   0x9   : > { %s3906_s26 = smov (%p33_p0, %s32_s26), 0  ;;  %s3908_s27 = smov (!%p33_p0, %s35_s27), %s3197_s24 }
   0xa   : > { %3885 = sst [smem:[#allocation8_spill]] %s3906_s26  ;;  %p396_p3 = pnand %p2342_p1, %p395_p2 }
   0xb   : > { %p37_p4 = scmp.ge.s32.totalorder %s3908_s27, 2  ;;  %p455_p5 = scmp.lt.s32.totalorder (!%p396_p3), %s3189_s22, 1 }
   0xc   : > { %399 = sbr.rel (%p396_p3) target bundleno = 1285 (0x505), region = 64  ;;  %p462_p6 = scmp.lt.s32.totalorder (!%p396_p3), %s3185_s21, 2 }
   0xd   : > { %s3910_s27 = smov (%p37_p4, %s3908_s27), 0  ;;  %p2349_p7 = scmp.ne.s32.totalorder (!%p396_p3), %s3185_s21, 0 }
   0xe   : > { %3886 = sst [smem:[#allocation9_spill]] %s3910_s27 }
  0x11   : > { %s3912_s22 = smov (!%p455_p5, %s3189_s22), 1 }
  0x12   : > { %s463_s28 = scalar_select %p462_p6, %s3185_s21, 2 }
  0x13   : > { %s2994_s29 = smul.u32 12, %s3912_s22  ;;  %s2612_s30 = sshll.u32 %s3912_s22, 4 }
  0x14   : > { %s2995_s13 = smul.u32 3, %s463_s28  ;;  %s2345_s14 = sshll.u32 %s463_s28, 1 }
  0x15   : > { %s3311_s17 = scalar_lea.vmem %s3860_s0, %s2994_s29  ;;  %s2996_s18 = smul.u32 9, %s3912_s22 }
  0x16   : > { %s2997_s19 = smul.u32 6, %s3912_s22  ;;  %s3316_s26 = scalar_lea.vmem %s3872_s12, %s2612_s30 }
  0x17   : > { %s466_s24 = sadd.s32 %s2996_s18, %s2995_s13  ;;  %487 = sbr.rel (%p2349_p7) target bundleno = 295 (0x127), region = 68 }
  0x18   : > { %s2344_s23 = sshll.u32 %s466_s24, 2  ;;  %s475_s25 = sadd.s32 %s2997_s19, %s2345_s14 }
  0x19   : > { %s3321_s9 = scalar_lea.vmem %s3861_s1, %s2344_s23  ;;  %s2346_s28 = sshll.u32 %s475_s25, 3 }
  0x1a   : > { %s3326_s29 = scalar_lea.vmem %s3871_s11, %s2346_s28 }
  0x1c   : > { %v3044_v0 = vld [vmem:[%s3862_s2 + $0x78] sm:$0xff]   ;;  %v3203_v1 = vmov 0.0   ;;  %v3046_v3 = vld [vmem:[%s3862_s2 + $0x70] sm:$0xff]   ;;  %vm3204_vm0 = vmmov 0   ;;  %v3048_v5 = vld [vmem:[%s3862_s2 + $0x68] sm:$0xff]   ;;  %vm746_vm2 = vcmask 1046528  }
  0x1d   : > { %2734 = vmatprep.subr.bf16.mxu0 %v3203_v1  ;;  %853 = vst [vmem:[#allocation3 + $0x8] sm:$0xff] %v3203_v1  ;;  %854 = vst [vmem:[#allocation3] sm:$0xff] %v3203_v1  ;;  %2754 = vmatprep.subr.bf16.mxu1 %v3203_v1  ;;  %v3045_v2 = vld [vmem:[%s3862_s2 + $0x38] sm:$0xff]   ;;  %v3047_v4 = vld [vmem:[%s3862_s2 + $0x30] sm:$0xff]   ;;  %vm532_vm1 = vsmask.f32 7424 }
  0x1e   : > { %2735 = vmatpush3.bf16.msra.mxu0 %v3044_v0  ;;  %2750 = vmatprep.mubr.msk.bf16.mxu0 %vm3204_vm0, %v3203_v1  ;;  %v3049_v6 = vld [vmem:[%s3862_s2 + $0x28] sm:$0xff]   ;;  %v3050_v7 = vld [vmem:[%s3862_s2 + $0x60] sm:$0xff]   ;;  %v3052_v9 = vld [vmem:[%s3862_s2 + $0x58] sm:$0xff]  }
  0x1f   : > { %2755 = vmatpush3.bf16.msra.mxu1 %v3045_v2  ;;  %2736 = vmatprep.subr.bf16.mxu0 %v3203_v1  ;;  %v3051_v8 = vld [vmem:[%s3862_s2 + $0x20] sm:$0xff]   ;;  %v3053_v10 = vld [vmem:[%s3862_s2 + $0x18] sm:$0xff]   ;;  %v3054_v13 = vld [vmem:[%s3862_s2 + $0x50] sm:$0xff]  }
  0x20   : > { %2756 = vmatprep.subr.bf16.mxu1 %v3203_v1  ;;  %2770 = vmatprep.mubr.msk.bf16.mxu1 %vm3204_vm0, %v3203_v1  ;;  %v488_v11 = vld [vmem:[%s3311_s17] sm:$0xf]  ;;  %v489_v12 = vld [vmem:[%s3311_s17 + $0x4] sm:$0xf]  ;;  %v3055_v16 = vld [vmem:[%s3862_s2 + $0x10] sm:$0xff]  }
  0x21   : > { %v2366_v14 = vcombine.low %v488_v11, %v489_v12  ;;  %v3061_v15 = vld [vmem:[%s3311_s17 + $0x8] ss:$0 sps:$4 sm:$0x11]   ;;  %v3058_v23 = vld [vmem:[%s3862_s2 + $0x40] sm:$0xff]   ;;  %v3062_v28 = vld [vmem:[%s3862_s2 + $0xb8] sm:$0xff]  }
  0x22   : > { %2737 = vmatpush3.bf16.msra.mxu0 %v3046_v3  ;;  %v3056_v18 = vld [vmem:[%s3862_s2 + $0x48] sm:$0xff]   ;;  %v541_v21 = vshll.u32 %v3061_v15, 16  ;;  %v3059_v26 = vld [vmem:[%s3862_s2] sm:$0xff]   ;;  %v3063_v29 = vld [vmem:[%s3862_s2 + $0xb0] sm:$0xff]   ;;  %v748_v39 = vrot.slane %v3061_v15, 1 }
  0x23   : > { %2757 = vmatpush3.bf16.msra.mxu1 %v3047_v4  ;;  %2738 = vmatprep.subr.bf16.mxu0 %v3203_v1  ;;  %v536_v17 = vshll.u32 %v2366_v14, 16  ;;  %v534_v19 = vshrl.u32 %v2366_v14, 16  ;;  %v3057_v22 = vld [vmem:[%s3862_s2 + $0x8] sm:$0xff]   ;;  %v3065_v31 = vld [vmem:[%s3862_s2 + $0xa0] sm:$0xff]   ;;  %v3066_v32 = vld [vmem:[%s3862_s2 + $0x98] sm:$0xff]  }
  0x24   : > { %2758 = vmatprep.subr.bf16.mxu1 %v3203_v1  ;;  %v543_v25 = vrot.slane %v541_v21, 1  ;;  %v3064_v30 = vld [vmem:[%s3862_s2 + $0xa8] sm:$0xff]   ;;  %v3067_v33 = vld [vmem:[%s3862_s2 + $0x90] sm:$0xff]   ;;  %v725_v34 = vld [vmem:[%s3311_s17] sm:$0xe] }
  0x25   : > { %v538_v20 = vrot.slane %v536_v17, 1  ;;  %v3068_v35 = vld [vmem:[%s3862_s2 + $0x88] sm:$0xff]   ;;  %v2400_v36 = vcombine.low %v725_v34, %v489_v12  ;;  %v3069_v37 = vld [vmem:[%s3862_s2 + $0x80] sm:$0xff]  }
  0x26   : > { %2739 = vmatpush3.bf16.msra.mxu0 %v3048_v5  ;;  %v2409_v51 = vld [vmem:[%s3864_s4] ss:$0 sm:$0xff] }
  0x27   : > { %2759 = vmatpush3.bf16.msra.mxu1 %v3049_v6  ;;  %2740 = vmatprep.subr.bf16.mxu0 %v3203_v1  ;;  %v539_v24 = vor.u32 %v538_v20, %v534_v19  ;;  %v747_v38 = vrot.slane %v2400_v36, 1 }
  0x28   : > { %2760 = vmatprep.subr.bf16.mxu1 %v3203_v1 }
  0x29   : > { %v544_v27 = vsel %vm532_vm1, %v539_v24, %v543_v25  ;;  %v749_v40 = vsel %vm746_vm2, %v747_v38, %v748_v39 }
  0x2a   : > { %2741 = vmatpush3.bf16.msra.mxu0 %v3050_v7 }
  0x2b   : > { %2761 = vmatpush3.bf16.msra.mxu1 %v3051_v8  ;;  %2742 = vmatprep.subr.bf16.mxu0 %v3203_v1 }
  0x2c   : > { %2762 = vmatprep.subr.bf16.mxu1 %v3203_v1 }
  0x2e   : > { %2743 = vmatpush3.bf16.msra.mxu0 %v3052_v9 }
  0x2f   : > { %2763 = vmatpush3.bf16.msra.mxu1 %v3053_v10  ;;  %2744 = vmatprep.subr.bf16.mxu0 %v3203_v1 }
  0x30   : > { %2764 = vmatprep.subr.bf16.mxu1 %v3203_v1 }
  0x32   : > { %2745 = vmatpush3.bf16.msra.mxu0 %v3054_v13 }
  0x33   : > { %2765 = vmatpush3.bf16.msra.mxu1 %v3055_v16  ;;  %2746 = vmatprep.subr.bf16.mxu0 %v3203_v1 }
  0x34   : > { %2766 = vmatprep.subr.bf16.mxu1 %v3203_v1 }
  0x36   : > { %2747 = vmatpush3.bf16.msra.mxu0 %v3056_v18 }
  0x37   : > { %2767 = vmatpush3.bf16.msra.mxu1 %v3057_v22  ;;  %2748 = vmatprep.subr.bf16.mxu0 %v3203_v1 }
  0x38   : > { %2768 = vmatprep.subr.bf16.mxu1 %v3203_v1 }
  0x3a   : > { %2749 = vmatpush3.bf16.msra.mxu0 %v3058_v23 }
  0x3b   : > { %2769 = vmatpush3.bf16.msra.mxu1 %v3059_v26  ;;  %2774 = vmatprep.subr.bf16.mxu0 %v3203_v1 }
  0x3d   : > { %2751 = vmatmul.mubr.bf16.vlgmr.msra.gmra.mxu0 %v544_v27 }
  0x3e   : > { %2771 = vmatmul.mubr.bf16.vlgmr.msra.gmra.mxu1 %v2366_v14  ;;  %2775 = vmatpush3.bf16.msra.mxu0 %v3062_v28 }
  0x3f   : > { %2776 = vmatprep.subr.bf16.mxu0 %v3203_v1  ;;  %2790 = vmatprep.mubr.msk.bf16.mxu0 %vm3204_vm0, %v3203_v1 }
  0x42   : > { %2777 = vmatpush3.bf16.msra.mxu0 %v3063_v29 }
  0x43   : > { %2778 = vmatprep.subr.bf16.mxu0 %v3203_v1 }
  0x46   : > { %2779 = vmatpush3.bf16.msra.mxu0 %v3064_v30 }
  0x47   : > { %2780 = vmatprep.subr.bf16.mxu0 %v3203_v1 }
  0x4a   : > { %2781 = vmatpush3.bf16.msra.mxu0 %v3065_v31 }
  0x4b   : > { %2782 = vmatprep.subr.bf16.mxu0 %v3203_v1 }
  0x4e   : > { %2783 = vmatpush3.bf16.msra.mxu0 %v3066_v32 }
  0x4f   : > { %2784 = vmatprep.subr.bf16.mxu0 %v3203_v1 }
  0x52   : > { %2785 = vmatpush3.bf16.msra.mxu0 %v3067_v33 }
  0x53   : > { %2786 = vmatprep.subr.bf16.mxu0 %v3203_v1 }
  0x56   : > { %2787 = vmatpush3.bf16.msra.mxu0 %v3068_v35 }
  0x57   : > { %2788 = vmatprep.subr.bf16.mxu0 %v3203_v1 }
  0x5a   : > { %2789 = vmatpush3.bf16.msra.mxu0 %v3069_v37 }
  0x5d   : > { %2791 = vmatmul.mubr.bf16.vlgmr.msra.gmra.mxu0 %v749_v40 }
  0xfd   : > { %v628_v41 = vpop.f32.mrf.mxu0 }
  0xfe   : > { %v718_v42 = vpop.f32.mrf.mxu1 }
  0xff   : > { %v2752_v43 = vpop.f32.mrf.mxu0  ;;  %v719_v49 = vadd.f32 %v718_v42, %v628_v41 }
 0x100   : > { %v2772_v44 = vpop.f32.mrf.mxu1 }
 0x101   : > { %v631_v45 = vpop.f32.mrf.mxu0 }
 0x102   : > { %v721_v46 = vpop.f32.mrf.mxu1 }
 0x103   : > { %v2753_v47 = vpop.f32.mrf.mxu0  ;;  %v722_v54 = vadd.f32 %v721_v46, %v631_v45 }
 0x104   : > { %v2773_v48 = vpop.f32.mrf.mxu1 }
 0x11d   : > { %v833_v50 = vpop.f32.mrf.mxu0 }
 0x11e   : > { %v840_v52 = vadd.f32 %v833_v50, %v719_v49 }
 0x11f   : > { %v2792_v53 = vpop.f32.mrf.mxu0 }
 0x120   : > { %v849_v55 = vadd.f32 %v2409_v51, %v840_v52 }
 0x121   : > { %v836_v56 = vpop.f32.mrf.mxu0 }
 0x122   : > { %851 = vst [vmem:[#allocation2] sm:$0xff] %v849_v55  ;;  %v841_v57 = vadd.f32 %v836_v56, %v722_v54 }
 0x123   : > { %v2793_v58 = vpop.f32.mrf.mxu0 }
 0x124   : > { %v850_v59 = vadd.f32 %v2409_v51, %v841_v57 }
 0x126   : > { %852 = vst [vmem:[#allocation2 + $0x8] sm:$0xff] %v850_v59 }
 0x127 PF: > { %v3071_v60 = vld [vmem:[%s3863_s3 + $0x38] sm:$0xff]   ;;  %v3205_v61 = vmov 0.0   ;;  %v3073_v63 = vld [vmem:[%s3863_s3 + $0x30] sm:$0xff]   ;;  %vm3206_vm3 = vmmov 0   ;;  %v3075_v1 = vld [vmem:[%s3863_s3 + $0x28] sm:$0xff]   ;;  %vm1126_vm5 = vcmask 1046528  }
 0x128   : > { %2794 = vmatprep.subr.bf16.mxu0 %v3205_v61  ;;  %2814 = vmatprep.subr.bf16.mxu1 %v3205_v61  ;;  %v3072_v62 = vld [vmem:[%s3863_s3 + $0x78] sm:$0xff]   ;;  %v3074_v0 = vld [vmem:[%s3863_s3 + $0x70] sm:$0xff]   ;;  %v3076_v2 = vld [vmem:[%s3863_s3 + $0x68] sm:$0xff]   ;;  %vm1000_vm4 = vsmask.f32 7424  ;;  %vm1259_vm6 = vcmask 1043456  }
 0x129   : > { %2795 = vmatpush3.bf16.msra.mxu0 %v3071_v60  ;;  %2810 = vmatprep.mubr.msk.bf16.mxu0 %vm3206_vm3, %v3205_v61  ;;  %v3077_v3 = vld [vmem:[%s3863_s3 + $0x20] sm:$0xff]   ;;  %v3079_v5 = vld [vmem:[%s3863_s3 + $0x18] sm:$0xff]   ;;  %v3081_v7 = vld [vmem:[%s3863_s3 + $0x10] sm:$0xff]   ;;  %vm1260_vm7 = vsmask.f32 7938  ;;  %vm1266_vm10 = vcmask 1040384  }
 0x12a   : > { %2815 = vmatpush3.bf16.msra.mxu1 %v3072_v62  ;;  %2796 = vmatprep.subr.bf16.mxu0 %v3205_v61  ;;  %v3078_v4 = vld [vmem:[%s3863_s3 + $0x60] sm:$0xff]   ;;  %v3080_v6 = vld [vmem:[%s3863_s3 + $0x58] sm:$0xff]   ;;  %v3082_v10 = vld [vmem:[%s3863_s3 + $0x50] sm:$0xff]   ;;  %vm1236_vm8 = vsmask.f32 256  ;;  %p2535_p8 = scmp.ne.s32.totalorder %s3185_s21, 2 }
 0x12b   : > { %2816 = vmatprep.subr.bf16.mxu1 %v3205_v61  ;;  %2830 = vmatprep.mubr.msk.bf16.mxu1 %vm3206_vm3, %v3205_v61  ;;  %v972_v8 = vld [vmem:[%s3321_s9] sm:$0xf]  ;;  %v973_v9 = vld [vmem:[%s3321_s9 + $0x4] sm:$0xf]  ;;  %v3083_v13 = vld [vmem:[%s3863_s3 + $0x8] sm:$0xff]   ;;  %s3895_s23 = sld [smem:[#allocation10_spill]] (!%p2535_p8) }
 0x12c   : > { %v2435_v11 = vcombine.low %v972_v8, %v973_v9  ;;  %v3090_v12 = vld [vmem:[%s3321_s9 + $0x8] ss:$0 sps:$4 sm:$0x11]   ;;  %v3085_v19 = vld [vmem:[%s3863_s3] sm:$0xff]   ;;  %v3088_v24 = vld [vmem:[%s3863_s3 + $0xb8] sm:$0xff]   ;;  %s3897_s18 = sld [smem:[#allocation12_spill]] (!%p2535_p8) }
 0x12d   : > { %2797 = vmatpush3.bf16.msra.mxu0 %v3073_v63  ;;  %v3084_v15 = vld [vmem:[%s3863_s3 + $0x48] sm:$0xff]   ;;  %v1009_v18 = vshll.u32 %v3090_v12, 16  ;;  %v3086_v20 = vld [vmem:[%s3863_s3 + $0x40] sm:$0xff]   ;;  %v3091_v26 = vld [vmem:[%s3863_s3 + $0xb0] sm:$0xff]   ;;  %v1128_v36 = vrot.slane %v3090_v12, 1  ;;  %s3899_s19 = sld [smem:[#allocation13_spill]] (!%p2535_p8) }
 0x12e   : > { %2817 = vmatpush3.bf16.msra.mxu1 %v3074_v0  ;;  %2798 = vmatprep.subr.bf16.mxu0 %v3205_v61  ;;  %v1004_v14 = vshll.u32 %v2435_v11, 16  ;;  %v1002_v16 = vshrl.u32 %v2435_v11, 16  ;;  %v3087_v21 = vld [vmem:[%s3321_s9] sm:$0xff]   ;;  %v3092_v27 = vld [vmem:[%s3863_s3 + $0xa8] sm:$0xff]   ;;  %v3094_v29 = vld [vmem:[%s3863_s3 + $0x98] sm:$0xff]  }
 0x12f   : > { %2818 = vmatprep.subr.bf16.mxu1 %v3205_v61  ;;  %v1011_v23 = vrot.slane %v1009_v18, 1  ;;  %v3093_v28 = vld [vmem:[%s3863_s3 + $0xa0] sm:$0xff]   ;;  %v3095_v30 = vld [vmem:[%s3863_s3 + $0x90] sm:$0xff]   ;;  %v3096_v32 = vld [vmem:[%s3863_s3 + $0x88] sm:$0xff]   ;;  %vm1237_vm11 = vsmask.f32 4368 }
 0x130   : > { %v1006_v17 = vrot.slane %v1004_v14, 1  ;;  %v1105_v31 = vld [vmem:[%s3321_s9] sm:$0xe]  ;;  %v3099_v38 = vld [vmem:[%s3865_s5 + $0x38] sm:$0xff]   ;;  %v3100_v39 = vld [vmem:[%s3865_s5 + $0x30] sm:$0xff]  }
 0x131   : > { %2799 = vmatpush3.bf16.msra.mxu0 %v3075_v1  ;;  %v2461_v33 = vcombine.low %v1105_v31, %v973_v9  ;;  %v3097_v34 = vld [vmem:[%s3863_s3 + $0x80] sm:$0xff]   ;;  %v3101_v40 = vld [vmem:[%s3865_s5 + $0x28] sm:$0xff]   ;;  %v3102_v41 = vld [vmem:[%s3865_s5 + $0x78] sm:$0xff]   ;;  %s3896_s30 = smov (!%p2535_p8), %s3895_s23 }
 0x132   : > { %2819 = vmatpush3.bf16.msra.mxu1 %v3076_v2  ;;  %2800 = vmatprep.subr.bf16.mxu0 %v3205_v61  ;;  %v1007_v22 = vor.u32 %v1006_v17, %v1002_v16  ;;  %v3103_v42 = vld [vmem:[%s3865_s5 + $0x20] sm:$0xff]   ;;  %v3104_v43 = vld [vmem:[%s3865_s5 + $0x70] sm:$0xff]   ;;  %v3105_v44 = vld [vmem:[%s3865_s5 + $0x18] sm:$0xff]  }
 0x133   : > { %2820 = vmatprep.subr.bf16.mxu1 %v3205_v61  ;;  %v1127_v35 = vrot.slane %v2461_v33, 1  ;;  %v3106_v45 = vld [vmem:[%s3865_s5 + $0x68] sm:$0xff]   ;;  %v3107_v46 = vld [vmem:[%s3865_s5 + $0x10] sm:$0xff]   ;;  %v3108_v47 = vld [vmem:[%s3865_s5 + $0x60] sm:$0xff]  }
 0x134   : > { %v1012_v25 = vsel %vm1000_vm4, %v1007_v22, %v1011_v23  ;;  %v3109_v48 = vld [vmem:[%s3865_s5 + $0x8] sm:$0xff]   ;;  %v3110_v49 = vld [vmem:[%s3865_s5 + $0x58] sm:$0xff]   ;;  %v3111_v50 = vld [vmem:[%s3865_s5] sm:$0xff]  }
 0x135   : > { %2801 = vmatpush3.bf16.msra.mxu0 %v3077_v3  ;;  %v1129_v37 = vsel %vm1126_vm5, %v1127_v35, %v1128_v36  ;;  %v3112_v51 = vld [vmem:[%s3865_s5 + $0x50] sm:$0xff]   ;;  %v3115_v52 = vld [vmem:[%s3865_s5 + $0x48] sm:$0xff]   ;;  %v3117_v53 = vld [vmem:[%s3865_s5 + $0x40] sm:$0xff]  }
 0x136   : > { %2821 = vmatpush3.bf16.msra.mxu1 %v3078_v4  ;;  %2802 = vmatprep.subr.bf16.mxu0 %v3205_v61  ;;  %v855_v63 = vld [vmem:[#allocation2] sm:$0xff]  ;;  %v856_v1 = vld [vmem:[#allocation2 + $0x8] sm:$0xff]  ;;  %v1225_v14 = vld [vmem:[#allocation3] sm:$0xff] }
 0x137   : > { %2822 = vmatprep.subr.bf16.mxu1 %v3205_v61  ;;  %vm3619_vm9 = vmand %vm1259_vm6, %vm1260_vm7  ;;  %v1262_v23 = vld [vmem:[#allocation4] sm:$0xf]  ;;  %v1268_v31 = vld [vmem:[#allocation4 + $0x8] sm:$0x1] }
 0x138   : > { %vm3626_vm12 = vmand %vm1266_vm10, %vm1236_vm8 }
 0x139   : > { %2803 = vmatpush3.bf16.msra.mxu0 %v3079_v5  ;;  %vm3630_vm13 = vmor %vm1236_vm8, %vm1237_vm11 }
 0x13a   : > { %2823 = vmatpush3.bf16.msra.mxu1 %v3080_v6  ;;  %2804 = vmatprep.subr.bf16.mxu0 %v3205_v61  ;;  %v1224_v6 = vld [vmem:[#allocation3 + $0x8] sm:$0xff]  ;;  %vm3642_vm14 = vmand %vm1266_vm10, %vm1260_vm7 }
 0x13b   : > { %2824 = vmatprep.subr.bf16.mxu1 %v3205_v61 }
 0x13d   : > { %2805 = vmatpush3.bf16.msra.mxu0 %v3081_v7 }
 0x13e   : > { %2825 = vmatpush3.bf16.msra.mxu1 %v3082_v10  ;;  %2806 = vmatprep.subr.bf16.mxu0 %v3205_v61 }
 0x13f   : > { %2826 = vmatprep.subr.bf16.mxu1 %v3205_v61 }
 0x141   : > { %2807 = vmatpush3.bf16.msra.mxu0 %v3083_v13 }
 0x142   : > { %2827 = vmatpush3.bf16.msra.mxu1 %v3084_v15  ;;  %2808 = vmatprep.subr.bf16.mxu0 %v3205_v61 }
 0x143   : > { %2828 = vmatprep.subr.bf16.mxu1 %v3205_v61 }
 0x145   : > { %2809 = vmatpush3.bf16.msra.mxu0 %v3085_v19 }
 0x146   : > { %2829 = vmatpush3.bf16.msra.mxu1 %v3086_v20  ;;  %2834 = vmatprep.subr.bf16.mxu0 %v3205_v61 }
 0x147   : > { %2854 = vmatprep.subr.bf16.mxu1 %v3205_v61 }
 0x148   : > { %2811 = vmatmul.mubr.bf16.vlgmr.msra.gmra.mxu0 %v3087_v21 }
 0x149   : > { %2835 = vmatpush3.bf16.msra.mxu0 %v3088_v24  ;;  %2831 = vmatmul.mubr.bf16.vlgmr.msra.gmra.mxu1 %v1012_v25 }
 0x14a   : > { %2836 = vmatprep.subr.bf16.mxu0 %v3205_v61  ;;  %2850 = vmatprep.mubr.msk.bf16.mxu0 %vm3206_vm3, %v3205_v61 }
 0x14b   : > { %2870 = vmatprep.mubr.msk.bf16.mxu1 %vm3206_vm3, %v3205_v61  ;;  %2855 = vmatpush3.bf16.msra.mxu1 %v3099_v38 }
 0x14c   : > { %2856 = vmatprep.subr.bf16.mxu1 %v3205_v61 }
 0x14d   : > { %2837 = vmatpush3.bf16.msra.mxu0 %v3091_v26 }
 0x14e   : > { %2838 = vmatprep.subr.bf16.mxu0 %v3205_v61 }
 0x14f   : > { %2857 = vmatpush3.bf16.msra.mxu1 %v3100_v39 }
 0x150   : > { %2858 = vmatprep.subr.bf16.mxu1 %v3205_v61 }
 0x151   : > { %2839 = vmatpush3.bf16.msra.mxu0 %v3092_v27 }
 0x152   : > { %2840 = vmatprep.subr.bf16.mxu0 %v3205_v61 }
 0x153   : > { %2859 = vmatpush3.bf16.msra.mxu1 %v3101_v40 }
 0x154   : > { %2860 = vmatprep.subr.bf16.mxu1 %v3205_v61 }
 0x155   : > { %2841 = vmatpush3.bf16.msra.mxu0 %v3093_v28 }
 0x156   : > { %2842 = vmatprep.subr.bf16.mxu0 %v3205_v61 }
 0x157   : > { %2861 = vmatpush3.bf16.msra.mxu1 %v3103_v42 }
 0x158   : > { %2862 = vmatprep.subr.bf16.mxu1 %v3205_v61 }
 0x159   : > { %2843 = vmatpush3.bf16.msra.mxu0 %v3094_v29 }
 0x15a   : > { %2844 = vmatprep.subr.bf16.mxu0 %v3205_v61 }
 0x15b   : > { %2863 = vmatpush3.bf16.msra.mxu1 %v3105_v44 }
 0x15c   : > { %2864 = vmatprep.subr.bf16.mxu1 %v3205_v61 }
 0x15d   : > { %2845 = vmatpush3.bf16.msra.mxu0 %v3095_v30 }
 0x15e   : > { %2846 = vmatprep.subr.bf16.mxu0 %v3205_v61 }
 0x15f   : > { %2865 = vmatpush3.bf16.msra.mxu1 %v3107_v46 }
 0x160   : > { %2866 = vmatprep.subr.bf16.mxu1 %v3205_v61 }
 0x161   : > { %2847 = vmatpush3.bf16.msra.mxu0 %v3096_v32 }
 0x162   : > { %2848 = vmatprep.subr.bf16.mxu0 %v3205_v61 }
 0x163   : > { %2867 = vmatpush3.bf16.msra.mxu1 %v3109_v48  ;;  %v3116_v48 = vld [vmem:[%s3865_s5 + $0xb0] sm:$0xff]  }
 0x164   : > { %2868 = vmatprep.subr.bf16.mxu1 %v3205_v61 }
 0x165   : > { %2849 = vmatpush3.bf16.msra.mxu0 %v3097_v34 }
 0x166   : > { %2874 = vmatprep.subr.bf16.mxu0 %v3205_v61 }
 0x167   : > { %2869 = vmatpush3.bf16.msra.mxu1 %v3111_v50 }
 0x168   : > { %2851 = vmatmul.mubr.bf16.vlgmr.msra.gmra.mxu0 %v1129_v37  ;;  %2894 = vmatprep.subr.bf16.mxu1 %v3205_v61 }
 0x169   : > { %2890 = vmatprep.mubr.msk.bf16.mxu0 %vm3206_vm3, %v3205_v61  ;;  %2875 = vmatpush3.bf16.msra.mxu0 %v3102_v41 }
 0x16a   : > { %2876 = vmatprep.subr.bf16.mxu0 %v3205_v61 }
 0x16d   : > { %2877 = vmatpush3.bf16.msra.mxu0 %v3104_v43  ;;  %v3114_v43 = vld [vmem:[%s3865_s5 + $0xb8] sm:$0xff]  }
 0x16e   : > { %2878 = vmatprep.subr.bf16.mxu0 %v3205_v61 }
 0x171   : > { %2879 = vmatpush3.bf16.msra.mxu0 %v3106_v45 }
 0x172   : > { %2880 = vmatprep.subr.bf16.mxu0 %v3205_v61 }
 0x175   : > { %2881 = vmatpush3.bf16.msra.mxu0 %v3108_v47 }
 0x176   : > { %2882 = vmatprep.subr.bf16.mxu0 %v3205_v61 }
 0x179   : > { %2883 = vmatpush3.bf16.msra.mxu0 %v3110_v49 }
 0x17a   : > { %2884 = vmatprep.subr.bf16.mxu0 %v3205_v61 }
 0x17d   : > { %2885 = vmatpush3.bf16.msra.mxu0 %v3112_v51 }
 0x17e   : > { %2886 = vmatprep.subr.bf16.mxu0 %v3205_v61 }
 0x181   : > { %2887 = vmatpush3.bf16.msra.mxu0 %v3115_v52 }
 0x182   : > { %2888 = vmatprep.subr.bf16.mxu0 %v3205_v61 }
 0x185   : > { %2889 = vmatpush3.bf16.msra.mxu0 %v3117_v53 }
 0x208   : > { %v963_v54 = vpop.f32.mrf.mxu0 }
 0x209   : > { %v1096_v55 = vpop.f32.mrf.mxu1  ;;  %v970_v0 = vadd.f32 %v963_v54, %v855_v63  ;;  %v3118_v54 = vld [vmem:[%s3865_s5 + $0xa8] sm:$0xff]  }
 0x20a   : > { %v2812_v56 = vpop.f32.mrf.mxu0 }
 0x20b   : > { %v2832_v57 = vpop.f32.mrf.mxu1  ;;  %v1103_v2 = vadd.f32 %v1096_v55, %v970_v0  ;;  %v3125_v0 = vld [vmem:[%s3865_s5 + $0x80] sm:$0xff]  }
 0x20c   : > { %v966_v58 = vpop.f32.mrf.mxu0 }
 0x20d   : > { %v1099_v59 = vpop.f32.mrf.mxu1  ;;  %v971_v3 = vadd.f32 %v966_v58, %v856_v1  ;;  %v3121_v58 = vld [vmem:[%s3865_s5 + $0xa0] sm:$0xff]  }
 0x20e   : > { %v2813_v60 = vpop.f32.mrf.mxu0 }
 0x20f   : > { %v2833_v62 = vpop.f32.mrf.mxu1  ;;  %v1104_v8 = vadd.f32 %v1099_v59, %v971_v3  ;;  %v3122_v59 = vld [vmem:[%s3865_s5 + $0x98] sm:$0xff]   ;;  %v3123_v60 = vld [vmem:[%s3865_s5 + $0x90] sm:$0xff]  }
 0x210   : > { %v3124_v62 = vld [vmem:[%s3865_s5 + $0x88] sm:$0xff]  }
 0x228   : > { %v1213_v4 = vpop.f32.mrf.mxu0 }
 0x229   : > { %v1220_v5 = vadd.f32 %v1213_v4, %v1103_v2 }
 0x22a   : > { %v2852_v7 = vpop.f32.mrf.mxu0 }
 0x22b   : > { %v1222_v9 = vmax.f32 %v1220_v5, 0.0 }
 0x22c   : > { %v1216_v10 = vpop.f32.mrf.mxu0 }
 0x22d   : > { %v1226_v11 = vadd.f32 %v1224_v6, %v1222_v9  ;;  %v2613_v12 = vpack.c.bf16 %v1222_v9, %v1222_v9  ;;  %v1221_v13 = vadd.f32 %v1216_v10, %v1104_v8 }
 0x22e   : > { %v2853_v15 = vpop.f32.mrf.mxu0 }
 0x22f   : > { %1228 = vst [vmem:[#allocation3 + $0x8] sm:$0xff] %v1226_v11  ;;  %v1240_v16 = vshrl.u32 %v2613_v12, 16  ;;  %v1223_v17 = vmax.f32 %v1221_v13, 0.0  ;;  %v1243_v19 = vshll.u32 %v2613_v12, 16 }
 0x231   : > { %v1242_v18 = vrot.slane %v1240_v16, 7  ;;  %v1227_v20 = vadd.f32 %v1225_v14, %v1223_v17  ;;  %v2614_v21 = vpack.c.bf16 %v1223_v17, %v1223_v17 }
 0x233   : > { %v1245_v24 = vor.u32 %v1243_v19, %v1242_v18  ;;  %1229 = vst [vmem:[#allocation3] sm:$0xff] %v1227_v20  ;;  %v1248_v25 = vshrl.u32 %v2614_v21, 16  ;;  %v1251_v29 = vshll.u32 %v2614_v21, 16  ;;  %v1246_v32 = vrot.slane %v1242_v18, 4 }
 0x235   : > { %v1263_v26 = vsel %vm3619_vm9, %v1245_v24, %v1262_v23  ;;  %v1250_v28 = vrot.slane %v1248_v25, 7  ;;  %v2473_v40 = vrot.slane %v1251_v29, 11 }
 0x236   : > { %1264 = vst [vmem:[#allocation4] sm:$0xf] %v1263_v26 }
 0x237   : > { %v1253_v33 = vor.u32 %v1251_v29, %v1250_v28  ;;  %v1255_v34 = vrot.slane %v1250_v28, 4 }
 0x239   : > { %v1254_v35 = vsel %vm3630_vm13, %v1246_v32, %v1253_v33  ;;  %v1269_v36 = vsel %vm3626_vm12, %v1255_v34, %v1268_v31 }
 0x23a   : > { %1265 = vst [vmem:[#allocation4 + $0x4] sm:$0xf] %v1254_v35  ;;  %1270 = vst [vmem:[#allocation4 + $0x8] sm:$0x1] %v1269_v36 }
 0x23d   : > { %v1274_v37 = vld [vmem:[#allocation4] sm:$0x1]  ;;  %v1538_v63 = vld [vmem:[#allocation4] sm:$0xe] }
 0x23e   : > { %v1275_v38 = vsel %vm3626_vm12, %v1240_v16, %v1274_v37 }
 0x23f   : > { %1276 = vst [vmem:[#allocation4] sm:$0x1] %v1275_v38 }
 0x241   : > { %v1281_v41 = vld [vmem:[#allocation4 + $0x8] sm:$0x1]  ;;  %v1407_v44 = vld [vmem:[#allocation4 + $0x4] sm:$0xf] }
 0x242   : > { %v1282_v42 = vsel %vm3642_vm14, %v2473_v40, %v1281_v41  ;;  %v2526_v1 = vcombine.low %v1538_v63, %v1407_v44 }
 0x243   : > { %1283 = vst [vmem:[#allocation4 + $0x8] sm:$0x1] %v1282_v42 }
 0x244   : > { %v1559_v3 = vrot.slane %v2526_v1, 1 }
 0x246   : > { %v3113_v45 = vld [vmem:[#allocation4] sm:$0xff]  }
 0x247   : > { %v1406_v46 = vld [vmem:[#allocation4] sm:$0xf]  ;;  %2871 = vmatmul.mubr.bf16.vlgmr.msra.gmra.mxu1 %v3113_v45 }
 0x248   : > { %v2500_v47 = vcombine.low %v1406_v46, %v1407_v44  ;;  %2895 = vmatpush3.bf16.msra.mxu1 %v3114_v43  ;;  %2910 = vmatprep.mubr.msk.bf16.mxu1 %vm3206_vm3, %v3205_v61 }
 0x249   : > { %2896 = vmatprep.subr.bf16.mxu1 %v3205_v61 }
 0x24a   : > { %v1437_v49 = vshll.u32 %v2500_v47, 16  ;;  %v3120_v50 = vld [vmem:[#allocation4 + $0x8] ss:$0 sps:$4 sm:$0x11]   ;;  %v1435_v51 = vshrl.u32 %v2500_v47, 16 }
 0x24b   : > { %v1442_v53 = vshll.u32 %v3120_v50, 16  ;;  %v1560_v2 = vrot.slane %v3120_v50, 1 }
 0x24c   : > { %v1439_v52 = vrot.slane %v1437_v49, 1  ;;  %2897 = vmatpush3.bf16.msra.mxu1 %v3116_v48 }
 0x24d   : > { %2898 = vmatprep.subr.bf16.mxu1 %v3205_v61  ;;  %v1444_v56 = vrot.slane %v1442_v53, 1  ;;  %v1561_v4 = vsel %vm1126_vm5, %v1559_v3, %v1560_v2 }
 0x24e   : > { %v1440_v55 = vor.u32 %v1439_v52, %v1435_v51 }
 0x250   : > { %v1445_v57 = vsel %vm1000_vm4, %v1440_v55, %v1444_v56  ;;  %2899 = vmatpush3.bf16.msra.mxu1 %v3118_v54 }
 0x251   : > { %2891 = vmatmul.mubr.bf16.vlgmr.msra.gmra.mxu0 %v1445_v57  ;;  %2900 = vmatprep.subr.bf16.mxu1 %v3205_v61 }
 0x254   : > { %2901 = vmatpush3.bf16.msra.mxu1 %v3121_v58 }
 0x255   : > { %2902 = vmatprep.subr.bf16.mxu1 %v3205_v61 }
 0x258   : > { %2903 = vmatpush3.bf16.msra.mxu1 %v3122_v59 }
 0x259   : > { %2904 = vmatprep.subr.bf16.mxu1 %v3205_v61 }
 0x25c   : > { %2905 = vmatpush3.bf16.msra.mxu1 %v3123_v60 }
 0x25d   : > { %2906 = vmatprep.subr.bf16.mxu1 %v3205_v61 }
 0x260   : > { %2907 = vmatpush3.bf16.msra.mxu1 %v3124_v62 }
 0x261   : > { %2908 = vmatprep.subr.bf16.mxu1 %v3205_v61  ;;  %v2483_v61 = vld [vmem:[%s3866_s6] ss:$0 sm:$0xff] }
 0x264   : > { %2909 = vmatpush3.bf16.msra.mxu1 %v3125_v0 }
 0x267   : > { %2911 = vmatmul.mubr.bf16.vlgmr.msra.gmra.mxu1 %v1561_v4 }
 0x307   : > { %v1391_v5 = vpop.f32.mrf.mxu1 }
 0x308   : > { %v1404_v13 = vadd.f32 %v2483_v61, %v1391_v5 }
 0x309   : > { %v2872_v6 = vpop.f32.mrf.mxu1 }
 0x30b   : > { %v1394_v7 = vpop.f32.mrf.mxu1 }
 0x30c   : > { %v1405_v16 = vadd.f32 %v2483_v61, %v1394_v7 }
 0x30d   : > { %v2873_v8 = vpop.f32.mrf.mxu1 }
 0x311   : > { %v1529_v9 = vpop.f32.mrf.mxu0 }
 0x312   : > { %v1536_v14 = vadd.f32 %v1529_v9, %v1404_v13 }
 0x313   : > { %v2892_v10 = vpop.f32.mrf.mxu0 }
 0x315   : > { %v1532_v11 = vpop.f32.mrf.mxu0 }
 0x316   : > { %v1537_v19 = vadd.f32 %v1532_v11, %v1405_v16 }
 0x317   : > { %v2893_v12 = vpop.f32.mrf.mxu0 }
 0x327   : > { %v1645_v15 = vpop.f32.mrf.mxu1 }
 0x328   : > { %v1652_v17 = vadd.f32 %v1645_v15, %v1536_v14 }
 0x329   : > { %v2912_v18 = vpop.f32.mrf.mxu1 }
 0x32a   : > { %v1654_v20 = vmax.f32 %v1652_v17, 0.0 }
 0x32b   : > { %v1648_v21 = vpop.f32.mrf.mxu1 }
 0x32c   : > { %1656 = vst [vmem:[%s3326_s29] sm:$0xff] %v1654_v20  ;;  %v1653_v23 = vadd.f32 %v1648_v21, %v1537_v19  ;;  %1661 = sbr.rel (%p2535_p8) target bundleno = 1285 (0x505), region = 72 }
 0x32d   : > { %v2913_v24 = vpop.f32.mrf.mxu1 }
 0x32e   : > { %v1655_v25 = vmax.f32 %v1653_v23, 0.0 }
 0x330   : > { %1657 = vst [vmem:[%s3326_s29 + $0x8] sm:$0xff] %v1655_v25  ;;  %s3898_s29 = sld [smem:[#allocation11_spill]] (!%p2535_p8) }
 0x331   : > { %v3127_v26 = vld [vmem:[%s3895_s23 + $0x38] sm:$0xff]   ;;  %v3207_v28 = vmov 0.0   ;;  %v3128_v29 = vld [vmem:[%s3896_s30 + $0x30] sm:$0xff]   ;;  %vm3208_vm15 = vmmov 0   ;;  %v3130_v33 = vld [vmem:[%s3896_s30 + $0x28] sm:$0xff]  }
 0x332   : > { %2914 = vmatprep.subr.bf16.mxu0 %v3207_v28  ;;  %2934 = vmatprep.subr.bf16.mxu1 %v3207_v28  ;;  %v3129_v31 = vld [vmem:[%s3896_s30 + $0x78] sm:$0xff]   ;;  %v3131_v32 = vld [vmem:[%s3896_s30 + $0x70] sm:$0xff]   ;;  %v3133_v34 = vld [vmem:[%s3896_s30 + $0x68] sm:$0xff]  }
 0x333   : > { %2915 = vmatpush3.bf16.msra.mxu0 %v3127_v26  ;;  %2930 = vmatprep.mubr.msk.bf16.mxu0 %vm3208_vm15, %v3207_v28  ;;  %v3132_v35 = vld [vmem:[%s3896_s30 + $0x20] sm:$0xff]   ;;  %v3134_v37 = vld [vmem:[%s3896_s30 + $0x18] sm:$0xff]   ;;  %v1663_v41 = vld [vmem:[#allocation3] sm:$0xff] }
 0x334   : > { %2916 = vmatprep.subr.bf16.mxu0 %v3207_v28  ;;  %2950 = vmatprep.mubr.msk.bf16.mxu1 %vm3208_vm15, %v3207_v28  ;;  %v3135_v36 = vld [vmem:[%s3896_s30 + $0x60] sm:$0xff]   ;;  %v3137_v38 = vld [vmem:[%s3896_s30 + $0x58] sm:$0xff]   ;;  %v1665_v43 = vmul.f32 0.33333334, %v1663_v41  ;;  %v3136_v44 = vld [vmem:[%s3896_s30 + $0x10] sm:$0xff]  }
 0x335   : > { %2935 = vmatpush3.bf16.msra.mxu1 %v3129_v31  ;;  %v1662_v40 = vld [vmem:[#allocation3 + $0x8] sm:$0xff]  ;;  %v3139_v47 = vld [vmem:[%s3896_s30 + $0x50] sm:$0xff]   ;;  %v3138_v52 = vld [vmem:[%s3896_s30 + $0x8] sm:$0xff]  }
 0x336   : > { %2936 = vmatprep.subr.bf16.mxu1 %v3207_v28  ;;  %v1664_v42 = vmul.f32 0.33333334, %v1662_v40  ;;  %v2616_v46 = vpack.c.bf16 %v1665_v43, %v1665_v43  ;;  %v3141_v53 = vld [vmem:[%s3896_s30 + $0x48] sm:$0xff]   ;;  %v1692_v56 = vld [vmem:[#allocation4] sm:$0xf]  ;;  %v3144_v8 = vld [vmem:[%s3896_s30 + $0xb8] sm:$0xff]  }
 0x337   : > { %2917 = vmatpush3.bf16.msra.mxu0 %v3128_v29  ;;  %v1696_v57 = vld [vmem:[#allocation4 + $0x8] sm:$0x1]  ;;  %v3140_v63 = vld [vmem:[%s3896_s30] sm:$0xff]   ;;  %v3147_v39 = vld [vmem:[%s3896_s30 + $0xb0] sm:$0xff]  }
 0x338   : > { %2918 = vmatprep.subr.bf16.mxu0 %v3207_v28  ;;  %v2615_v45 = vpack.c.bf16 %v1664_v42, %v1664_v42  ;;  %v1681_v50 = vshrl.u32 %v2616_v46, 16  ;;  %v1684_v51 = vshll.u32 %v2616_v46, 16  ;;  %v3143_v4 = vld [vmem:[%s3896_s30 + $0x40] sm:$0xff]   ;;  %v3148_v17 = vld [vmem:[%s3896_s30 + $0xa8] sm:$0xff]   ;;  %v3150_v20 = vld [vmem:[%s3896_s30 + $0x98] sm:$0xff]  }
 0x339   : > { %2937 = vmatpush3.bf16.msra.mxu1 %v3131_v32  ;;  %v3149_v19 = vld [vmem:[%s3896_s30 + $0xa0] sm:$0xff]   ;;  %v3151_v21 = vld [vmem:[%s3896_s30 + $0x90] sm:$0xff]   ;;  %v3152_v24 = vld [vmem:[%s3896_s30 + $0x88] sm:$0xff]  }
 0x33a   : > { %2938 = vmatprep.subr.bf16.mxu1 %v3207_v28  ;;  %v1673_v48 = vshrl.u32 %v2615_v45, 16  ;;  %v1676_v49 = vshll.u32 %v2615_v45, 16  ;;  %v1683_v55 = vrot.slane %v1681_v50, 7  ;;  %v2539_v3 = vrot.slane %v1684_v51, 11  ;;  %v3153_v26 = vld [vmem:[%s3896_s30 + $0x80] sm:$0xff]   ;;  %v3161_v40 = vld [vmem:[%s3897_s18 + $0x8] sm:$0xff]  }
 0x33b   : > { %2919 = vmatpush3.bf16.msra.mxu0 %v3130_v33  ;;  %v3155_v33 = vld [vmem:[%s3897_s18 + $0x38] sm:$0xff]   ;;  %v3162_v41 = vld [vmem:[%s3897_s18] sm:$0xff]  }
 0x33c   : > { %2920 = vmatprep.subr.bf16.mxu0 %v3207_v28  ;;  %v1675_v54 = vrot.slane %v1673_v48, 7  ;;  %v1686_v60 = vor.u32 %v1684_v51, %v1683_v55  ;;  %v1688_v62 = vrot.slane %v1683_v55, 4  ;;  %v2549_v50 = vld [vmem:[%s3898_s29] ss:$0 sm:$0xff] }
 0x33d   : > { %2939 = vmatpush3.bf16.msra.mxu1 %v3133_v34  ;;  %v3156_v34 = vld [vmem:[%s3897_s18 + $0x30] sm:$0xff]  }
 0x33e   : > { %2940 = vmatprep.subr.bf16.mxu1 %v3207_v28  ;;  %v1678_v58 = vor.u32 %v1676_v49, %v1675_v54  ;;  %v1679_v59 = vrot.slane %v1675_v54, 4  ;;  %v1697_v2 = vsel %vm3626_vm12, %v1688_v62, %v1696_v57 }
 0x33f   : > { %2921 = vmatpush3.bf16.msra.mxu0 %v3132_v35  ;;  %1698 = vst [vmem:[#allocation4 + $0x8] sm:$0x1] %v1697_v2  ;;  %v3157_v35 = vld [vmem:[%s3897_s18 + $0x28] sm:$0xff]  }
 0x340   : > { %2922 = vmatprep.subr.bf16.mxu0 %v3207_v28  ;;  %v1687_v0 = vsel %vm3630_vm13, %v1679_v59, %v1686_v60  ;;  %v1693_v1 = vsel %vm3619_vm9, %v1678_v58, %v1692_v56 }
 0x341   : > { %2941 = vmatpush3.bf16.msra.mxu1 %v3135_v36  ;;  %1694 = vst [vmem:[#allocation4] sm:$0xf] %v1693_v1  ;;  %1695 = vst [vmem:[#allocation4 + $0x4] sm:$0xf] %v1687_v0  ;;  %v3158_v36 = vld [vmem:[%s3897_s18 + $0x20] sm:$0xff]  }
 0x342   : > { %2942 = vmatprep.subr.bf16.mxu1 %v3207_v28  ;;  %v2601_v0 = vld [vmem:[%s3899_s19] ss:$0 sm:$0xff] }
 0x343   : > { %2923 = vmatpush3.bf16.msra.mxu0 %v3134_v37  ;;  %v3159_v37 = vld [vmem:[%s3897_s18 + $0x18] sm:$0xff]  }
 0x344   : > { %2924 = vmatprep.subr.bf16.mxu0 %v3207_v28 }
 0x345   : > { %2943 = vmatpush3.bf16.msra.mxu1 %v3137_v38  ;;  %v3160_v38 = vld [vmem:[%s3897_s18 + $0x10] sm:$0xff]  }
 0x346   : > { %2944 = vmatprep.subr.bf16.mxu1 %v3207_v28  ;;  %v1708_v30 = vld [vmem:[#allocation4 + $0x8] sm:$0x1] }
 0x347   : > { %2925 = vmatpush3.bf16.msra.mxu0 %v3136_v44  ;;  %v1709_v6 = vsel %vm3642_vm14, %v2539_v3, %v1708_v30 }
 0x348   : > { %2926 = vmatprep.subr.bf16.mxu0 %v3207_v28  ;;  %v1702_v22 = vld [vmem:[#allocation4] sm:$0x1]  ;;  %1710 = vst [vmem:[#allocation4 + $0x8] sm:$0x1] %v1709_v6  ;;  %v1834_v7 = vld [vmem:[#allocation4 + $0x4] sm:$0xf] }
 0x349   : > { %2945 = vmatpush3.bf16.msra.mxu1 %v3139_v47  ;;  %v1703_v5 = vsel %vm3626_vm12, %v1673_v48, %v1702_v22  ;;  %v1965_v23 = vld [vmem:[#allocation4] sm:$0xe] }
 0x34a   : > { %2946 = vmatprep.subr.bf16.mxu1 %v3207_v28  ;;  %1704 = vst [vmem:[#allocation4] sm:$0x1] %v1703_v5  ;;  %v2592_v25 = vcombine.low %v1965_v23, %v1834_v7 }
 0x34b   : > { %2927 = vmatpush3.bf16.msra.mxu0 %v3138_v52 }
 0x34c   : > { %2928 = vmatprep.subr.bf16.mxu0 %v3207_v28  ;;  %v1986_v29 = vrot.slane %v2592_v25, 1 }
 0x34d   : > { %2947 = vmatpush3.bf16.msra.mxu1 %v3141_v53 }
 0x34e   : > { %2948 = vmatprep.subr.bf16.mxu1 %v3207_v28 }
 0x34f   : > { %2929 = vmatpush3.bf16.msra.mxu0 %v3140_v63  ;;  %v3146_v12 = vld [vmem:[#allocation4 + $0x8] ss:$0 sps:$4 sm:$0x11]  }
 0x350   : > { %2954 = vmatprep.subr.bf16.mxu0 %v3207_v28  ;;  %v1869_v27 = vshll.u32 %v3146_v12, 16  ;;  %v1987_v31 = vrot.slane %v3146_v12, 1 }
 0x351   : > { %2949 = vmatpush3.bf16.msra.mxu1 %v3143_v4  ;;  %v3142_v9 = vld [vmem:[#allocation4] sm:$0xff]  }
 0x352   : > { %2974 = vmatprep.subr.bf16.mxu1 %v3207_v28  ;;  %v1833_v10 = vld [vmem:[#allocation4] sm:$0xf]  ;;  %2931 = vmatmul.mubr.bf16.vlgmr.msra.gmra.mxu0 %v3142_v9  ;;  %v1871_v15 = vrot.slane %v1869_v27, 1  ;;  %v1988_v32 = vsel %vm1126_vm5, %v1986_v29, %v1987_v31 }
 0x353   : > { %v2566_v11 = vcombine.low %v1833_v10, %v1834_v7  ;;  %2955 = vmatpush3.bf16.msra.mxu0 %v3144_v8  ;;  %2970 = vmatprep.mubr.msk.bf16.mxu0 %vm3208_vm15, %v3207_v28 }
 0x354   : > { %2956 = vmatprep.subr.bf16.mxu0 %v3207_v28 }
 0x355   : > { %v1862_v61 = vshrl.u32 %v2566_v11, 16  ;;  %v1864_v13 = vshll.u32 %v2566_v11, 16 }
 0x357   : > { %v1866_v14 = vrot.slane %v1864_v13, 1  ;;  %2957 = vmatpush3.bf16.msra.mxu0 %v3147_v39 }
 0x358   : > { %2958 = vmatprep.subr.bf16.mxu0 %v3207_v28 }
 0x359   : > { %v1867_v16 = vor.u32 %v1866_v14, %v1862_v61 }
 0x35b   : > { %v1872_v18 = vsel %vm1000_vm4, %v1867_v16, %v1871_v15  ;;  %2959 = vmatpush3.bf16.msra.mxu0 %v3148_v17 }
 0x35c   : > { %2951 = vmatmul.mubr.bf16.vlgmr.msra.gmra.mxu1 %v1872_v18  ;;  %2960 = vmatprep.subr.bf16.mxu0 %v3207_v28 }
 0x35d   : > { %2990 = vmatprep.mubr.msk.bf16.mxu1 %vm3208_vm15, %v3207_v28  ;;  %2975 = vmatpush3.bf16.msra.mxu1 %v3155_v33 }
 0x35e   : > { %2976 = vmatprep.subr.bf16.mxu1 %v3207_v28 }
 0x35f   : > { %2961 = vmatpush3.bf16.msra.mxu0 %v3149_v19 }
 0x360   : > { %2962 = vmatprep.subr.bf16.mxu0 %v3207_v28 }
 0x361   : > { %2977 = vmatpush3.bf16.msra.mxu1 %v3156_v34 }
 0x362   : > { %2978 = vmatprep.subr.bf16.mxu1 %v3207_v28 }
 0x363   : > { %2963 = vmatpush3.bf16.msra.mxu0 %v3150_v20 }
 0x364   : > { %2964 = vmatprep.subr.bf16.mxu0 %v3207_v28 }
 0x365   : > { %2979 = vmatpush3.bf16.msra.mxu1 %v3157_v35 }
 0x366   : > { %2980 = vmatprep.subr.bf16.mxu1 %v3207_v28 }
 0x367   : > { %2965 = vmatpush3.bf16.msra.mxu0 %v3151_v21 }
 0x368   : > { %2966 = vmatprep.subr.bf16.mxu0 %v3207_v28 }
 0x369   : > { %2981 = vmatpush3.bf16.msra.mxu1 %v3158_v36 }
 0x36a   : > { %2982 = vmatprep.subr.bf16.mxu1 %v3207_v28 }
 0x36b   : > { %2967 = vmatpush3.bf16.msra.mxu0 %v3152_v24 }
 0x36c   : > { %2968 = vmatprep.subr.bf16.mxu0 %v3207_v28 }
 0x36d   : > { %2983 = vmatpush3.bf16.msra.mxu1 %v3159_v37 }
 0x36e   : > { %2984 = vmatprep.subr.bf16.mxu1 %v3207_v28 }
 0x36f   : > { %2969 = vmatpush3.bf16.msra.mxu0 %v3153_v26 }
 0x371   : > { %2985 = vmatpush3.bf16.msra.mxu1 %v3160_v38 }
 0x372   : > { %2971 = vmatmul.mubr.bf16.vlgmr.msra.gmra.mxu0 %v1988_v32  ;;  %2986 = vmatprep.subr.bf16.mxu1 %v3207_v28 }
 0x375   : > { %2987 = vmatpush3.bf16.msra.mxu1 %v3161_v40 }
 0x376   : > { %2988 = vmatprep.subr.bf16.mxu1 %v3207_v28 }
 0x379   : > { %2989 = vmatpush3.bf16.msra.mxu1 %v3162_v41 }
 0x412   : > { %v1818_v42 = vpop.f32.mrf.mxu0 }
 0x413   : > { %v1831_v51 = vadd.f32 %v2549_v50, %v1818_v42 }
 0x414   : > { %v2932_v43 = vpop.f32.mrf.mxu0 }
 0x416   : > { %v1821_v44 = vpop.f32.mrf.mxu0 }
 0x417   : > { %v1832_v28 = vadd.f32 %v2549_v50, %v1821_v44 }
 0x418   : > { %v2933_v45 = vpop.f32.mrf.mxu0 }
 0x41c   : > { %v1956_v46 = vpop.f32.mrf.mxu1 }
 0x41d   : > { %v1963_v53 = vadd.f32 %v1956_v46, %v1831_v51 }
 0x41e   : > { %v2952_v47 = vpop.f32.mrf.mxu1 }
 0x420   : > { %v1959_v48 = vpop.f32.mrf.mxu1 }
 0x421   : > { %v1964_v55 = vadd.f32 %v1959_v48, %v1832_v28 }
 0x422   : > { %v2953_v49 = vpop.f32.mrf.mxu1 }
 0x432   : > { %v2072_v52 = vpop.f32.mrf.mxu0 }
 0x433   : > { %v2079_v56 = vadd.f32 %v2072_v52, %v1963_v53 }
 0x434   : > { %v2972_v54 = vpop.f32.mrf.mxu0 }
 0x435   : > { %v2081_v60 = vmax.f32 %v2079_v56, 0.0 }
 0x436   : > { %v2075_v57 = vpop.f32.mrf.mxu0 }
 0x437   : > { %v2080_v58 = vadd.f32 %v2075_v57, %v1964_v55 }
 0x438   : > { %v2973_v59 = vpop.f32.mrf.mxu0 }
 0x439   : > { %v2082_v62 = vmax.f32 %v2080_v58, 0.0 }
 0x43b   : > { %v2083_v63 = vpack.c.bf16 %v2082_v62, %v2081_v60 }
 0x43d   : > { %2991 = vmatmul.mubr.bf16.vlgmr.msra.gmra.mxu1 %v2083_v63 }
 0x4fd   : > { %v2189_v1 = vpop.f32.mrf.mxu1 }
 0x4fe   : > { %v2190_v2 = vadd.f32 %v2601_v0, %v2189_v1 }
 0x4ff   : > { %v2992_v3 = vpop.f32.mrf.mxu1 }
 0x500   : > { %2196 = vst [vmem:[%s3316_s26] sm:$0xff] %v2190_v2 }
 0x501   : > { %v2192_v4 = vpop.f32.mrf.mxu1 }
 0x502   : > { %v2193_v22 = vadd.f32 %v2601_v0, %v2192_v4 }
 0x503   : > { %v2993_v30 = vpop.f32.mrf.mxu1 }
 0x504   : > { %2197 = vst [vmem:[%s3316_s26 + $0x8] sm:$0xff] %v2193_v22 }
 0x505 PF: > { %s3900_s17 = sld [smem:[#allocation7_spill]] }
 0x506   : > { %s3901_s21 = sld [smem:[#allocation5_spill]] }
 0x507   : > { %s3902_s22 = sld [smem:[#allocation6_spill]] }
 0x508   : > { %s3903_s23 = sld [smem:[#allocation8_spill]] }
 0x509   : > { %s3904_s24 = sld [smem:[#allocation9_spill]] }
 0x50b   : > { %s23_s25 = sadd.s32 1, %s3900_s17  }
 0x50c   : > { %p20_p9 = scmp.ge.s32.totalorder %s23_s25, 8  }
 0x50e   :  { %22 = sbr.rel (!%p20_p9) target bundleno = 5 (0x5), region = 125 }

</bundles_post_ra>
